<compile_context>
chip_gen: v7x
topology: tpu7x:2x2x1
jax: 0.10.0
libtpu: 0.0.40
codegen_flags: <defaults>
</compile_context>

<pallas_src>
import numpy as np
import jax
import jax.numpy as jnp
from jax.experimental import pallas as pl
from jax.experimental.pallas import tpu as pltpu

_INV_SQRT2 = 0.7071067811865476
PAD_MAX = 4                      # largest depthwise half-width (9 // 2)

# (name, kh, kw) for the seven depthwise convolutions, in a fixed pack order.
DW_DEFS = (("w33", 3, 3), ("w15", 1, 5), ("w51", 5, 1),
           ("w17", 1, 7), ("w71", 7, 1), ("w19", 1, 9), ("w91", 9, 1))


# ----------------------------- math helpers ------------------------------ #

def _erf_poly(x):
    # Abramowitz & Stegun 7.1.26 erf polynomial, |abs err| < 1.5e-7.
    a1, a2, a3, a4, a5 = (0.254829592, -0.284496736, 1.421413741,
                          -1.453152027, 1.061405429)
    p = 0.3275911
    ax = jnp.abs(x)
    t = 1.0 / (1.0 + p * ax)
    poly = ((((a5 * t + a4) * t + a3) * t + a2) * t + a1) * t
    y = 1.0 - poly * jnp.exp(-ax * ax)
    return jnp.where(x >= 0.0, y, -y)


def _gelu_exact(x):
    # torch.nn.GELU() default is the exact (erf-based) GELU.
    return 0.5 * x * (1.0 + _erf_poly(x * _INV_SQRT2))


def _sigmoid(x):
    return 1.0 / (1.0 + jnp.exp(-x))


# ------------------------- parameter packing ----------------------------- #

def _weight_layout(C):
    """Column offsets of every parameter inside the packed (C, ncols) tile."""
    off = {"pw_A": 0, "fc1_A": C, "fc2_A": 2 * C,
           "pw_b": 3 * C, "fc1_b": 3 * C + 1, "fc2_b": 3 * C + 2}
    o = 3 * C + 3
    for name, _, _ in DW_DEFS:           # depthwise biases, one column each
        off["b" + name[1:]] = o
        o += 1
    for name, kh, kw in DW_DEFS:         # depthwise taps, kh*kw columns each
        off[name] = o
        o += kh * kw
    return off, o


def _pack_weights(params, C, Ci):
    """Pack every parameter into a single (C, 3C+61) f32 tile (one DMA)."""
    f32 = jnp.float32
    pw_A = params["pw_w"].T.astype(f32)                               # (C, C)
    fc1_A = jnp.zeros((C, C), f32).at[:Ci, :].set(params["fc1_w"].T)  # rows>=Ci zero
    fc2_A = jnp.zeros((C, C), f32).at[:, :Ci].set(params["fc2_w"].T)  # cols>=Ci zero
    fc1_b = jnp.zeros((C, 1), f32).at[:Ci, :].set(params["fc1_b"].T)
    cols = [pw_A, fc1_A, fc2_A,
            params["pw_b"].T.astype(f32), fc1_b, params["fc2_b"].T.astype(f32)]
    for name, _, _ in DW_DEFS:
        cols.append(params["b" + name[1:]].T.astype(f32))             # (C, 1)
    for name, _, _ in DW_DEFS:
        cols.append(params[name].T.astype(f32))                       # (C, kh*kw)
    return jnp.concatenate(cols, axis=1)


# ------------------------------ the kernel ------------------------------- #

def _make_kernel(C, H, W, BT):
    S = H * W
    L = BT * S
    off, _ = _weight_layout(C)

    def kernel(x_ref, w_ref, coord_ref, out_ref):
        x = x_ref[...].astype(jnp.float32)          # (C, L), spatial on lanes
        wp = w_ref[...]                             # (C, ncols) packed weights
        coords = coord_ref[...]                     # (2, L) int32: row, col
        row = coords[0:1, :]
        col = coords[1:2, :]

        pw_A = wp[:, off["pw_A"]:off["pw_A"] + C]
        fc1_A = wp[:, off["fc1_A"]:off["fc1_A"] + C]
        fc2_A = wp[:, off["fc2_A"]:off["fc2_A"] + C]
        pw_b = wp[:, off["pw_b"]:off["pw_b"] + 1]
        fc1_b = wp[:, off["fc1_b"]:off["fc1_b"] + 1]
        fc2_b = wp[:, off["fc2_b"]:off["fc2_b"] + 1]

        def pointwise(t):                           # shared self.conv (1x1 + bias)
            return jnp.dot(pw_A, t, preferred_element_type=jnp.float32) + pw_b

        # inputs = act(conv(inputs))
        y = _gelu_exact(pointwise(x))

        # ChannelAttention: avg/max pool per batch element, one batched MLP over
        # the stacked [avg_0..avg_{BT-1}, max_0..max_{BT-1}] columns.
        pooled = []
        for b in range(BT):
            seg = y[:, b * S:(b + 1) * S]
            pooled.append(jnp.sum(seg, axis=1, keepdims=True) * (1.0 / S))
        for b in range(BT):
            seg = y[:, b * S:(b + 1) * S]
            pooled.append(jnp.max(seg, axis=1, keepdims=True))
        pooled = jnp.concatenate(pooled, axis=1)                            # (C, 2*BT)
        h = jnp.maximum(
            jnp.dot(fc1_A, pooled, preferred_element_type=jnp.float32) + fc1_b, 0.0)
        sig = _sigmoid(
            jnp.dot(fc2_A, h, preferred_element_type=jnp.float32) + fc2_b)  # (C, 2*BT)
        att = sig[:, 0:BT] + sig[:, BT:2 * BT]                              # (C, BT)

        if BT == 1:
            y_att = y * att                        # channel_att_vec * inputs
        else:
            y_att = jnp.concatenate(
                [y[:, b * S:(b + 1) * S] * att[:, b:b + 1] for b in range(BT)],
                axis=1)

        # Boundary masks for shifted taps (single compare each; d == 0 not needed).
        row_ok = {d: (row + d < H) if d > 0 else (row + d >= 0)
                  for d in range(-PAD_MAX, PAD_MAX + 1) if d != 0}
        col_ok = {d: (col + d < W) if d > 0 else (col + d >= 0)
                  for d in range(-PAD_MAX, PAD_MAX + 1) if d != 0}

        def masked_shift(t, di, dj):
            # shifted[:, p] = t[:, p + di*W + dj], out-of-image lanes zeroed.
            if di == 0 and dj == 0:
                return t
            shift = (-(di * W + dj)) % L
            shifted = pltpu.roll(t, shift, axis=1)      # XLU slot, ~free vs VPU
            if di != 0 and dj != 0:
                m = row_ok[di] & col_ok[dj]
            elif di != 0:
                m = row_ok[di]
            else:
                m = col_ok[dj]
            return jnp.where(m, shifted, 0.0)

        def bias_of(name):
            b = "b" + name[1:]
            return wp[:, off[b]:off[b] + 1]

        def dwconv(t, name, kh, kw):
            # Depthwise "same" conv in flattened layout: roll + mask per tap.
            ph, pwid = kh // 2, kw // 2
            tap = off[name]
            acc = None
            for i in range(kh):
                for j in range(kw):
                    di, dj = i - ph, j - pwid
                    w_tap = wp[:, tap:tap + 1]          # (C, 1) per-channel tap
                    tap += 1
                    contrib = masked_shift(t, di, dj) * w_tap
                    acc = contrib if acc is None else acc + contrib
            return acc + bias_of(name)

        def hconv_shared(shifts, name, kw):
            # Horizontal depthwise conv from pre-shifted, pre-masked copies.
            pwid = kw // 2
            tap = off[name]
            acc = None
            for j in range(kw):
                dj = j - pwid
                w_tap = wp[:, tap:tap + 1]
                tap += 1
                contrib = shifts[dj] * w_tap
                acc = contrib if acc is None else acc + contrib
            return acc + bias_of(name)

        # x_init = dconv5_5(inputs)   (3x3 depthwise in this module)
        x_init = dwconv(y_att, "w33", 3, 3)
        xs = x_init                                  # incremental accumulation

        # The 1x5 / 1x7 / 1x9 convs all read x_init: share its masked lane
        # shifts (dj in [-4, 4]) across the three branches.
        xi_shift = {dj: masked_shift(x_init, 0, dj)
                    for dj in range(-PAD_MAX, PAD_MAX + 1)}

        xs = xs + dwconv(hconv_shared(xi_shift, "w15", 5), "w51", 5, 1)
        xs = xs + dwconv(hconv_shared(xi_shift, "w17", 7), "w71", 7, 1)
        xs = xs + dwconv(hconv_shared(xi_shift, "w19", 9), "w91", 9, 1)

        spatial_att = pointwise(xs)                  # self.conv (shared weights)
        out = pointwise(spatial_att * y_att)         # self.conv again
        out_ref[...] = out.astype(out_ref.dtype)

    return kernel


# ------------------------------- wrapper --------------------------------- #

def repblock_pallas(x_nchw, params, batch_block=None):
    """x_nchw: (B, C, H, W) float32, matching the PyTorch module's input."""
    B, C, H, W = x_nchw.shape
    S = H * W
    Ci = params["fc1_w"].shape[1]
    _, ncols = _weight_layout(C)

    if batch_block is None:
        # Prefer >= 2 parallel grid steps (megacore / v7x dual TC); fold the
        # rest of the batch into the lane axis.  Lane width must be a multiple
        # of 128 unless the block spans the whole batch.
        cand = [bt for bt in range(1, B + 1) if B % bt == 0 and (bt * S) % 128 == 0]
        pref = [bt for bt in cand if B // bt >= 2]
        batch_block = max(pref) if pref else (max(cand) if cand else B)
    BT = batch_block
    assert B % BT == 0
    L = BT * S
    n_blocks = B // BT

    # NCHW -> lane-dense (C, B*S): channels on sublanes, (batch, spatial) on lanes.
    x_flat = jnp.transpose(x_nchw.reshape(B, C, S), (1, 0, 2)).reshape(C, B * S)
    x_flat = x_flat.astype(jnp.float32)

    wpack = _pack_weights(params, C, Ci)                       # (C, ncols)

    # Static (row, col) index of every lane position inside one block
    # (precomputed host-side: avoids int div/mod inside the kernel).
    lane = np.arange(L, dtype=np.int64) % S
    coords = jnp.asarray(np.stack([lane // W, lane % W]).astype(np.int32))  # (2, L)

    kernel = _make_kernel(C, H, W, BT)

    out_flat = pl.pallas_call(
        kernel,
        out_shape=jax.ShapeDtypeStruct((C, B * S), jnp.float32),
        grid_spec=pltpu.PrefetchScalarGridSpec(
            num_scalar_prefetch=0,
            grid=(n_blocks,),
            in_specs=[
                pl.BlockSpec((C, L), lambda i: (0, i)),        # activations
                pl.BlockSpec((C, ncols), lambda i: (0, 0)),    # packed weights
                pl.BlockSpec((2, L), lambda i: (0, 0)),        # row/col coords
            ],
            out_specs=pl.BlockSpec((C, L), lambda i: (0, i)),
        ),
        compiler_params=pltpu.CompilerParams(
            dimension_semantics=("parallel",),
            vmem_limit_bytes=48 * 1024 * 1024),                # headroom under v7x 64 MiB
    )(x_flat, wpack, coords)

    out = out_flat.reshape(C, B, S).transpose(1, 0, 2).reshape(B, C, H, W)
    return out.astype(x_nchw.dtype)


# --------------------------- params & reference -------------------------- #

def make_params(C, reduce=4, seed=1):
    """Deterministic synthetic parameters (shapes follow RepBlock.__init__)."""
    Ci = C // reduce
    keys = jax.random.split(jax.random.PRNGKey(seed), 20)
    kit = iter(keys)

    def rnd(shape, scale):
        return jax.random.normal(next(kit), shape, dtype=jnp.float32) * scale

    p = {
        "pw_w": rnd((C, C), 0.25),    # self.conv 1x1 weight, stored (C_in, C_out)
        "pw_b": rnd((1, C), 0.1),
        "fc1_w": rnd((C, Ci), 0.3),   # ChannelAttention fc1 (1x1 conv)
        "fc1_b": rnd((1, Ci), 0.1),
        "fc2_w": rnd((Ci, C), 0.3),   # ChannelAttention fc2 (1x1 conv)
        "fc2_b": rnd((1, C), 0.1),
    }
    for name, kh, kw in DW_DEFS:                  # depthwise conv weights
        p[name] = rnd((kh * kw, C), 0.2)          # (kh*kw, C): w[i*kw+j, c]
        p["b" + name[1:]] = rnd((1, C), 0.05)
    return p


def repblock_reference(x_nchw, params):
    """Pure-JAX NCHW reference (lax conv/erf), mirrors the PyTorch module."""
    B, C, H, W = x_nchw.shape
    p = params
    dn = ("NCHW", "OIHW", "NCHW")
    hp = jax.lax.Precision.HIGHEST

    def conv1x1(t):
        w = p["pw_w"].T.reshape(C, C, 1, 1)
        return (jax.lax.conv_general_dilated(t, w, (1, 1), "VALID",
                                             dimension_numbers=dn, precision=hp)
                + p["pw_b"].reshape(1, C, 1, 1))

    def dconv(t, wn, bn, kh, kw):
        w = p[wn].reshape(kh, kw, C).transpose(2, 0, 1)[:, None, :, :]
        return (jax.lax.conv_general_dilated(
                    t, w, (1, 1), [(kh // 2, kh // 2), (kw // 2, kw // 2)],
                    dimension_numbers=dn, feature_group_count=C, precision=hp)
                + p[bn].reshape(1, C, 1, 1))

    def gelu(t):  # exact (erf) GELU == torch.nn.GELU()
        return 0.5 * t * (1.0 + jax.lax.erf(t * _INV_SQRT2))

    y = gelu(conv1x1(x_nchw))
    avg = jnp.mean(y, axis=(2, 3))
    mxv = jnp.max(y, axis=(2, 3))

    def ca(v):
        h = jnp.maximum(jnp.dot(v, p["fc1_w"], precision=hp) + p["fc1_b"], 0.0)
        return jax.nn.sigmoid(jnp.dot(h, p["fc2_w"], precision=hp) + p["fc2_b"])

    att = (ca(avg) + ca(mxv))[:, :, None, None]
    y_att = att * y
    x_init = dconv(y_att, "w33", "b33", 3, 3)
    x1 = dconv(dconv(x_init, "w15", "b15", 1, 5), "w51", "b51", 5, 1)
    x2 = dconv(dconv(x_init, "w17", "b17", 1, 7), "w71", "b71", 7, 1)
    x3 = dconv(dconv(x_init, "w19", "b19", 1, 9), "w91", "b91", 9, 1)
    xs = x1 + x2 + x3 + x_init
    return conv1x1(conv1x1(xs) * y_att)


if __name__ == "__main__":
    B, C, H, W = 2, 8, 16, 16              # channelAttention_reduce=4 -> Ci=2
    x = jax.random.normal(jax.random.PRNGKey(0), (B, C, H, W), dtype=jnp.float32)
    params = make_params(C, reduce=4, seed=1)

    out = jax.jit(repblock_pallas)(x, params)
    out = jax.block_until_ready(out)

    ref = repblock_reference(x, params)
    max_err = float(jnp.max(jnp.abs(out - ref)))
    assert out.shape == (B, C, H, W), out.shape
    assert max_err < 5e-3, f"mismatch vs reference: max abs err {max_err}"
    print("KERNEL_OK")
</pallas_src>

<mosaic_0001>
module attributes {stable_mosaic.version = 11 : i64} {
  func.func @kernel(%arg0: i32, %arg1: memref<8x256xf32, #tpu.memory_space<vmem>>, %arg2: memref<8x85xf32, #tpu.memory_space<vmem>>, %arg3: memref<2x256xi32, #tpu.memory_space<vmem>>, %arg4: memref<8x256xf32, #tpu.memory_space<vmem>>) attributes {dimension_semantics = [#tpu.dimension_semantics<parallel>], iteration_bounds = array<i64: 2>, scalar_prefetch = 0 : i64, scratch_operands = 0 : i64, tpu.core_type = #tpu.core_type<tc>, window_params = [{transform_indices = @transform_0, window_bounds = array<i64: 8, 256>}, {pipeline_mode = #tpu.pipeline_mode<synchronous>, transform_indices = @transform_1, window_bounds = array<i64: 8, 85>}, {pipeline_mode = #tpu.pipeline_mode<synchronous>, transform_indices = @transform_2, window_bounds = array<i64: 2, 256>}, {transform_indices = @transform_3, window_bounds = array<i64: 8, 256>}]} {
    %c0 = arith.constant 0 : index
    %c0_0 = arith.constant 0 : index
    %0 = vector.load %arg1[%c0, %c0_0] : memref<8x256xf32, #tpu.memory_space<vmem>>, vector<8x256xf32>
    %c0_1 = arith.constant 0 : index
    %c0_2 = arith.constant 0 : index
    %1 = vector.load %arg2[%c0_1, %c0_2] : memref<8x85xf32, #tpu.memory_space<vmem>>, vector<8x85xf32>
    %c0_3 = arith.constant 0 : index
    %c0_4 = arith.constant 0 : index
    %2 = vector.load %arg3[%c0_3, %c0_4] : memref<2x256xi32, #tpu.memory_space<vmem>>, vector<2x256xi32>
    %3 = vector.extract_strided_slice %2 {offsets = [0, 0], sizes = [1, 256], strides = [1, 1]} : vector<2x256xi32> to vector<1x256xi32>
    %4 = vector.extract_strided_slice %2 {offsets = [1, 0], sizes = [1, 256], strides = [1, 1]} : vector<2x256xi32> to vector<1x256xi32>
    %5 = vector.extract_strided_slice %1 {offsets = [0, 0], sizes = [8, 8], strides = [1, 1]} : vector<8x85xf32> to vector<8x8xf32>
    %6 = vector.extract_strided_slice %1 {offsets = [0, 8], sizes = [8, 8], strides = [1, 1]} : vector<8x85xf32> to vector<8x8xf32>
    %7 = vector.extract_strided_slice %1 {offsets = [0, 16], sizes = [8, 8], strides = [1, 1]} : vector<8x85xf32> to vector<8x8xf32>
    %8 = vector.extract_strided_slice %1 {offsets = [0, 24], sizes = [8, 1], strides = [1, 1]} : vector<8x85xf32> to vector<8x1xf32>
    %9 = vector.extract_strided_slice %1 {offsets = [0, 25], sizes = [8, 1], strides = [1, 1]} : vector<8x85xf32> to vector<8x1xf32>
    %10 = vector.extract_strided_slice %1 {offsets = [0, 26], sizes = [8, 1], strides = [1, 1]} : vector<8x85xf32> to vector<8x1xf32>
    %cst = arith.constant dense<0.000000e+00> : vector<8x256xf32>
    %11 = tpu.matmul %5, %0, %cst {dimension_numbers = #tpu.dot_dimension_numbers<[1], [0], [0], [1], [0, 0, 1, 1], [], []>} : vector<8x8xf32>, vector<8x256xf32>, vector<8x256xf32> -> vector<8x256xf32>
    %12 = vector.broadcast %8 : vector<8x1xf32> to vector<8x256xf32>
    %13 = arith.addf %11, %12 : vector<8x256xf32>
    %cst_5 = arith.constant 5.000000e-01 : f32
    %14 = vector.broadcast %cst_5 : f32 to vector<8x256xf32>
    %15 = arith.mulf %14, %13 : vector<8x256xf32>
    %cst_6 = arith.constant 0.707106769 : f32
    %16 = vector.broadcast %cst_6 : f32 to vector<8x256xf32>
    %17 = arith.mulf %13, %16 : vector<8x256xf32>
    %18 = math.absf %17 : vector<8x256xf32>
    %cst_7 = arith.constant 0.327591091 : f32
    %19 = vector.broadcast %cst_7 : f32 to vector<8x256xf32>
    %20 = arith.mulf %19, %18 : vector<8x256xf32>
    %cst_8 = arith.constant 1.000000e+00 : f32
    %21 = vector.broadcast %cst_8 : f32 to vector<8x256xf32>
    %22 = arith.addf %21, %20 : vector<8x256xf32>
    %cst_9 = arith.constant 1.000000e+00 : f32
    %23 = vector.broadcast %cst_9 : f32 to vector<8x256xf32>
    %24 = arith.divf %23, %22 : vector<8x256xf32>
    %cst_10 = arith.constant 1.06140542 : f32
    %25 = vector.broadcast %cst_10 : f32 to vector<8x256xf32>
    %26 = arith.mulf %25, %24 : vector<8x256xf32>
    %cst_11 = arith.constant -1.45315206 : f32
    %27 = vector.broadcast %cst_11 : f32 to vector<8x256xf32>
    %28 = arith.addf %26, %27 : vector<8x256xf32>
    %29 = arith.mulf %28, %24 : vector<8x256xf32>
    %cst_12 = arith.constant 1.42141378 : f32
    %30 = vector.broadcast %cst_12 : f32 to vector<8x256xf32>
    %31 = arith.addf %29, %30 : vector<8x256xf32>
    %32 = arith.mulf %31, %24 : vector<8x256xf32>
    %cst_13 = arith.constant -0.284496725 : f32
    %33 = vector.broadcast %cst_13 : f32 to vector<8x256xf32>
    %34 = arith.addf %32, %33 : vector<8x256xf32>
    %35 = arith.mulf %34, %24 : vector<8x256xf32>
    %cst_14 = arith.constant 0.254829586 : f32
    %36 = vector.broadcast %cst_14 : f32 to vector<8x256xf32>
    %37 = arith.addf %35, %36 : vector<8x256xf32>
    %38 = arith.mulf %37, %24 : vector<8x256xf32>
    %cst_15 = arith.constant 0.000000e+00 : f32
    %39 = vector.broadcast %cst_15 : f32 to vector<8x256xf32>
    %40 = arith.subf %39, %18 : vector<8x256xf32>
    %41 = arith.mulf %40, %18 : vector<8x256xf32>
    %42 = math.exp %41 : vector<8x256xf32>
    %43 = arith.mulf %38, %42 : vector<8x256xf32>
    %cst_16 = arith.constant 1.000000e+00 : f32
    %44 = vector.broadcast %cst_16 : f32 to vector<8x256xf32>
    %45 = arith.subf %44, %43 : vector<8x256xf32>
    %cst_17 = arith.constant 0.000000e+00 : f32
    %46 = vector.broadcast %cst_17 : f32 to vector<8x256xf32>
    %47 = arith.cmpf oge, %17, %46 : vector<8x256xf32>
    %cst_18 = arith.constant 0.000000e+00 : f32
    %48 = vector.broadcast %cst_18 : f32 to vector<8x256xf32>
    %49 = arith.subf %48, %45 : vector<8x256xf32>
    %50 = arith.select %47, %45, %49 : vector<8x256xi1>, vector<8x256xf32>
    %cst_19 = arith.constant 1.000000e+00 : f32
    %51 = vector.broadcast %cst_19 : f32 to vector<8x256xf32>
    %52 = arith.addf %51, %50 : vector<8x256xf32>
    %53 = arith.mulf %15, %52 : vector<8x256xf32>
    %cst_20 = arith.constant dense<0.000000e+00> : vector<8xf32>
    %54 = vector.multi_reduction <add>, %53, %cst_20 [1] : vector<8x256xf32> to vector<8xf32>
    %55 = vector.shape_cast %54 : vector<8xf32> to vector<8x1xf32>
    %cst_21 = arith.constant 3.906250e-03 : f32
    %56 = vector.broadcast %cst_21 : f32 to vector<8x1xf32>
    %57 = arith.mulf %55, %56 : vector<8x1xf32>
    %cst_22 = arith.constant dense<0xFF800000> : vector<8xf32>
    %58 = vector.multi_reduction <maximumf>, %53, %cst_22 [1] : vector<8x256xf32> to vector<8xf32>
    %59 = vector.shape_cast %58 : vector<8xf32> to vector<8x1xf32>
    %60 = tpu.concatenate %57, %59 in 1 : vector<8x1xf32>, vector<8x1xf32> -> vector<8x2xf32>
    %cst_23 = arith.constant dense<0.000000e+00> : vector<8x2xf32>
    %61 = tpu.matmul %6, %60, %cst_23 {dimension_numbers = #tpu.dot_dimension_numbers<[1], [0], [0], [1], [0, 0, 1, 1], [], []>} : vector<8x8xf32>, vector<8x2xf32>, vector<8x2xf32> -> vector<8x2xf32>
    %62 = vector.broadcast %9 : vector<8x1xf32> to vector<8x2xf32>
    %63 = arith.addf %61, %62 : vector<8x2xf32>
    %cst_24 = arith.constant 0.000000e+00 : f32
    %64 = vector.broadcast %cst_24 : f32 to vector<8x2xf32>
    %65 = arith.maximumf %63, %64 : vector<8x2xf32>
    %cst_25 = arith.constant dense<0.000000e+00> : vector<8x2xf32>
    %66 = tpu.matmul %7, %65, %cst_25 {dimension_numbers = #tpu.dot_dimension_numbers<[1], [0], [0], [1], [0, 0, 1, 1], [], []>} : vector<8x8xf32>, vector<8x2xf32>, vector<8x2xf32> -> vector<8x2xf32>
    %67 = vector.broadcast %10 : vector<8x1xf32> to vector<8x2xf32>
    %68 = arith.addf %66, %67 : vector<8x2xf32>
    %cst_26 = arith.constant 0.000000e+00 : f32
    %69 = vector.broadcast %cst_26 : f32 to vector<8x2xf32>
    %70 = arith.subf %69, %68 : vector<8x2xf32>
    %71 = math.exp %70 : vector<8x2xf32>
    %cst_27 = arith.constant 1.000000e+00 : f32
    %72 = vector.broadcast %cst_27 : f32 to vector<8x2xf32>
    %73 = arith.addf %72, %71 : vector<8x2xf32>
    %cst_28 = arith.constant 1.000000e+00 : f32
    %74 = vector.broadcast %cst_28 : f32 to vector<8x2xf32>
    %75 = arith.divf %74, %73 : vector<8x2xf32>
    %76 = vector.extract_strided_slice %75 {offsets = [0, 0], sizes = [8, 1], strides = [1, 1]} : vector<8x2xf32> to vector<8x1xf32>
    %77 = vector.extract_strided_slice %75 {offsets = [0, 1], sizes = [8, 1], strides = [1, 1]} : vector<8x2xf32> to vector<8x1xf32>
    %78 = arith.addf %76, %77 : vector<8x1xf32>
    %79 = vector.broadcast %78 : vector<8x1xf32> to vector<8x256xf32>
    %80 = arith.mulf %53, %79 : vector<8x256xf32>
    %c-4_i32 = arith.constant -4 : i32
    %81 = vector.broadcast %c-4_i32 : i32 to vector<1x256xi32>
    %82 = arith.addi %3, %81 : vector<1x256xi32>
    %c0_i32 = arith.constant 0 : i32
    %83 = vector.broadcast %c0_i32 : i32 to vector<1x256xi32>
    %84 = arith.cmpi sge, %82, %83 : vector<1x256xi32>
    %c-3_i32 = arith.constant -3 : i32
    %85 = vector.broadcast %c-3_i32 : i32 to vector<1x256xi32>
    %86 = arith.addi %3, %85 : vector<1x256xi32>
    %c0_i32_29 = arith.constant 0 : i32
    %87 = vector.broadcast %c0_i32_29 : i32 to vector<1x256xi32>
    %88 = arith.cmpi sge, %86, %87 : vector<1x256xi32>
    %c-2_i32 = arith.constant -2 : i32
    %89 = vector.broadcast %c-2_i32 : i32 to vector<1x256xi32>
    %90 = arith.addi %3, %89 : vector<1x256xi32>
    %c0_i32_30 = arith.constant 0 : i32
    %91 = vector.broadcast %c0_i32_30 : i32 to vector<1x256xi32>
    %92 = arith.cmpi sge, %90, %91 : vector<1x256xi32>
    %c-1_i32 = arith.constant -1 : i32
    %93 = vector.broadcast %c-1_i32 : i32 to vector<1x256xi32>
    %94 = arith.addi %3, %93 : vector<1x256xi32>
    %c0_i32_31 = arith.constant 0 : i32
    %95 = vector.broadcast %c0_i32_31 : i32 to vector<1x256xi32>
    %96 = arith.cmpi sge, %94, %95 : vector<1x256xi32>
    %c1_i32 = arith.constant 1 : i32
    %97 = vector.broadcast %c1_i32 : i32 to vector<1x256xi32>
    %98 = arith.addi %3, %97 : vector<1x256xi32>
    %c16_i32 = arith.constant 16 : i32
    %99 = vector.broadcast %c16_i32 : i32 to vector<1x256xi32>
    %100 = arith.cmpi slt, %98, %99 : vector<1x256xi32>
    %c2_i32 = arith.constant 2 : i32
    %101 = vector.broadcast %c2_i32 : i32 to vector<1x256xi32>
    %102 = arith.addi %3, %101 : vector<1x256xi32>
    %c16_i32_32 = arith.constant 16 : i32
    %103 = vector.broadcast %c16_i32_32 : i32 to vector<1x256xi32>
    %104 = arith.cmpi slt, %102, %103 : vector<1x256xi32>
    %c3_i32 = arith.constant 3 : i32
    %105 = vector.broadcast %c3_i32 : i32 to vector<1x256xi32>
    %106 = arith.addi %3, %105 : vector<1x256xi32>
    %c16_i32_33 = arith.constant 16 : i32
    %107 = vector.broadcast %c16_i32_33 : i32 to vector<1x256xi32>
    %108 = arith.cmpi slt, %106, %107 : vector<1x256xi32>
    %c4_i32 = arith.constant 4 : i32
    %109 = vector.broadcast %c4_i32 : i32 to vector<1x256xi32>
    %110 = arith.addi %3, %109 : vector<1x256xi32>
    %c16_i32_34 = arith.constant 16 : i32
    %111 = vector.broadcast %c16_i32_34 : i32 to vector<1x256xi32>
    %112 = arith.cmpi slt, %110, %111 : vector<1x256xi32>
    %c-4_i32_35 = arith.constant -4 : i32
    %113 = vector.broadcast %c-4_i32_35 : i32 to vector<1x256xi32>
    %114 = arith.addi %4, %113 : vector<1x256xi32>
    %c0_i32_36 = arith.constant 0 : i32
    %115 = vector.broadcast %c0_i32_36 : i32 to vector<1x256xi32>
    %116 = arith.cmpi sge, %114, %115 : vector<1x256xi32>
    %c-3_i32_37 = arith.constant -3 : i32
    %117 = vector.broadcast %c-3_i32_37 : i32 to vector<1x256xi32>
    %118 = arith.addi %4, %117 : vector<1x256xi32>
    %c0_i32_38 = arith.constant 0 : i32
    %119 = vector.broadcast %c0_i32_38 : i32 to vector<1x256xi32>
    %120 = arith.cmpi sge, %118, %119 : vector<1x256xi32>
    %c-2_i32_39 = arith.constant -2 : i32
    %121 = vector.broadcast %c-2_i32_39 : i32 to vector<1x256xi32>
    %122 = arith.addi %4, %121 : vector<1x256xi32>
    %c0_i32_40 = arith.constant 0 : i32
    %123 = vector.broadcast %c0_i32_40 : i32 to vector<1x256xi32>
    %124 = arith.cmpi sge, %122, %123 : vector<1x256xi32>
    %c-1_i32_41 = arith.constant -1 : i32
    %125 = vector.broadcast %c-1_i32_41 : i32 to vector<1x256xi32>
    %126 = arith.addi %4, %125 : vector<1x256xi32>
    %c0_i32_42 = arith.constant 0 : i32
    %127 = vector.broadcast %c0_i32_42 : i32 to vector<1x256xi32>
    %128 = arith.cmpi sge, %126, %127 : vector<1x256xi32>
    %c1_i32_43 = arith.constant 1 : i32
    %129 = vector.broadcast %c1_i32_43 : i32 to vector<1x256xi32>
    %130 = arith.addi %4, %129 : vector<1x256xi32>
    %c16_i32_44 = arith.constant 16 : i32
    %131 = vector.broadcast %c16_i32_44 : i32 to vector<1x256xi32>
    %132 = arith.cmpi slt, %130, %131 : vector<1x256xi32>
    %c2_i32_45 = arith.constant 2 : i32
    %133 = vector.broadcast %c2_i32_45 : i32 to vector<1x256xi32>
    %134 = arith.addi %4, %133 : vector<1x256xi32>
    %c16_i32_46 = arith.constant 16 : i32
    %135 = vector.broadcast %c16_i32_46 : i32 to vector<1x256xi32>
    %136 = arith.cmpi slt, %134, %135 : vector<1x256xi32>
    %c3_i32_47 = arith.constant 3 : i32
    %137 = vector.broadcast %c3_i32_47 : i32 to vector<1x256xi32>
    %138 = arith.addi %4, %137 : vector<1x256xi32>
    %c16_i32_48 = arith.constant 16 : i32
    %139 = vector.broadcast %c16_i32_48 : i32 to vector<1x256xi32>
    %140 = arith.cmpi slt, %138, %139 : vector<1x256xi32>
    %c4_i32_49 = arith.constant 4 : i32
    %141 = vector.broadcast %c4_i32_49 : i32 to vector<1x256xi32>
    %142 = arith.addi %4, %141 : vector<1x256xi32>
    %c16_i32_50 = arith.constant 16 : i32
    %143 = vector.broadcast %c16_i32_50 : i32 to vector<1x256xi32>
    %144 = arith.cmpi slt, %142, %143 : vector<1x256xi32>
    %145 = vector.extract_strided_slice %1 {offsets = [0, 34], sizes = [8, 1], strides = [1, 1]} : vector<8x85xf32> to vector<8x1xf32>
    %c17_i32 = arith.constant 17 : i32
    %146 = tpu.dynamic_rotate %80 by %c17_i32 dim 1 : vector<8x256xf32>, i32 -> vector<8x256xf32>
    %147 = arith.andi %96, %128 : vector<1x256xi1>
    %cst_51 = arith.constant 0.000000e+00 : f32
    %148 = vector.shape_cast %147 : vector<1x256xi1> to vector<1x256xi1>
    %149 = vector.broadcast %148 : vector<1x256xi1> to vector<8x256xi1>
    %150 = vector.broadcast %cst_51 : f32 to vector<8x256xf32>
    %151 = arith.select %149, %146, %150 : vector<8x256xi1>, vector<8x256xf32>
    %152 = vector.broadcast %145 : vector<8x1xf32> to vector<8x256xf32>
    %153 = arith.mulf %151, %152 : vector<8x256xf32>
    %154 = vector.extract_strided_slice %1 {offsets = [0, 35], sizes = [8, 1], strides = [1, 1]} : vector<8x85xf32> to vector<8x1xf32>
    %c16_i32_52 = arith.constant 16 : i32
    %155 = tpu.dynamic_rotate %80 by %c16_i32_52 dim 1 : vector<8x256xf32>, i32 -> vector<8x256xf32>
    %cst_53 = arith.constant 0.000000e+00 : f32
    %156 = vector.shape_cast %96 : vector<1x256xi1> to vector<1x256xi1>
    %157 = vector.broadcast %156 : vector<1x256xi1> to vector<8x256xi1>
    %158 = vector.broadcast %cst_53 : f32 to vector<8x256xf32>
    %159 = arith.select %157, %155, %158 : vector<8x256xi1>, vector<8x256xf32>
    %160 = vector.broadcast %154 : vector<8x1xf32> to vector<8x256xf32>
    %161 = arith.mulf %159, %160 : vector<8x256xf32>
    %162 = arith.addf %153, %161 : vector<8x256xf32>
    %163 = vector.extract_strided_slice %1 {offsets = [0, 36], sizes = [8, 1], strides = [1, 1]} : vector<8x85xf32> to vector<8x1xf32>
    %c15_i32 = arith.constant 15 : i32
    %164 = tpu.dynamic_rotate %80 by %c15_i32 dim 1 : vector<8x256xf32>, i32 -> vector<8x256xf32>
    %165 = arith.andi %96, %132 : vector<1x256xi1>
    %cst_54 = arith.constant 0.000000e+00 : f32
    %166 = vector.shape_cast %165 : vector<1x256xi1> to vector<1x256xi1>
    %167 = vector.broadcast %166 : vector<1x256xi1> to vector<8x256xi1>
    %168 = vector.broadcast %cst_54 : f32 to vector<8x256xf32>
    %169 = arith.select %167, %164, %168 : vector<8x256xi1>, vector<8x256xf32>
    %170 = vector.broadcast %163 : vector<8x1xf32> to vector<8x256xf32>
    %171 = arith.mulf %169, %170 : vector<8x256xf32>
    %172 = arith.addf %162, %171 : vector<8x256xf32>
    %173 = vector.extract_strided_slice %1 {offsets = [0, 37], sizes = [8, 1], strides = [1, 1]} : vector<8x85xf32> to vector<8x1xf32>
    %c1_i32_55 = arith.constant 1 : i32
    %174 = tpu.dynamic_rotate %80 by %c1_i32_55 dim 1 : vector<8x256xf32>, i32 -> vector<8x256xf32>
    %cst_56 = arith.constant 0.000000e+00 : f32
    %175 = vector.shape_cast %128 : vector<1x256xi1> to vector<1x256xi1>
    %176 = vector.broadcast %175 : vector<1x256xi1> to vector<8x256xi1>
    %177 = vector.broadcast %cst_56 : f32 to vector<8x256xf32>
    %178 = arith.select %176, %174, %177 : vector<8x256xi1>, vector<8x256xf32>
    %179 = vector.broadcast %173 : vector<8x1xf32> to vector<8x256xf32>
    %180 = arith.mulf %178, %179 : vector<8x256xf32>
    %181 = arith.addf %172, %180 : vector<8x256xf32>
    %182 = vector.extract_strided_slice %1 {offsets = [0, 38], sizes = [8, 1], strides = [1, 1]} : vector<8x85xf32> to vector<8x1xf32>
    %183 = vector.broadcast %182 : vector<8x1xf32> to vector<8x256xf32>
    %184 = arith.mulf %80, %183 : vector<8x256xf32>
    %185 = arith.addf %181, %184 : vector<8x256xf32>
    %186 = vector.extract_strided_slice %1 {offsets = [0, 39], sizes = [8, 1], strides = [1, 1]} : vector<8x85xf32> to vector<8x1xf32>
    %c255_i32 = arith.constant 255 : i32
    %187 = tpu.dynamic_rotate %80 by %c255_i32 dim 1 : vector<8x256xf32>, i32 -> vector<8x256xf32>
    %cst_57 = arith.constant 0.000000e+00 : f32
    %188 = vector.shape_cast %132 : vector<1x256xi1> to vector<1x256xi1>
    %189 = vector.broadcast %188 : vector<1x256xi1> to vector<8x256xi1>
    %190 = vector.broadcast %cst_57 : f32 to vector<8x256xf32>
    %191 = arith.select %189, %187, %190 : vector<8x256xi1>, vector<8x256xf32>
    %192 = vector.broadcast %186 : vector<8x1xf32> to vector<8x256xf32>
    %193 = arith.mulf %191, %192 : vector<8x256xf32>
    %194 = arith.addf %185, %193 : vector<8x256xf32>
    %195 = vector.extract_strided_slice %1 {offsets = [0, 40], sizes = [8, 1], strides = [1, 1]} : vector<8x85xf32> to vector<8x1xf32>
    %c241_i32 = arith.constant 241 : i32
    %196 = tpu.dynamic_rotate %80 by %c241_i32 dim 1 : vector<8x256xf32>, i32 -> vector<8x256xf32>
    %197 = arith.andi %100, %128 : vector<1x256xi1>
    %cst_58 = arith.constant 0.000000e+00 : f32
    %198 = vector.shape_cast %197 : vector<1x256xi1> to vector<1x256xi1>
    %199 = vector.broadcast %198 : vector<1x256xi1> to vector<8x256xi1>
    %200 = vector.broadcast %cst_58 : f32 to vector<8x256xf32>
    %201 = arith.select %199, %196, %200 : vector<8x256xi1>, vector<8x256xf32>
    %202 = vector.broadcast %195 : vector<8x1xf32> to vector<8x256xf32>
    %203 = arith.mulf %201, %202 : vector<8x256xf32>
    %204 = arith.addf %194, %203 : vector<8x256xf32>
    %205 = vector.extract_strided_slice %1 {offsets = [0, 41], sizes = [8, 1], strides = [1, 1]} : vector<8x85xf32> to vector<8x1xf32>
    %c240_i32 = arith.constant 240 : i32
    %206 = tpu.dynamic_rotate %80 by %c240_i32 dim 1 : vector<8x256xf32>, i32 -> vector<8x256xf32>
    %cst_59 = arith.constant 0.000000e+00 : f32
    %207 = vector.shape_cast %100 : vector<1x256xi1> to vector<1x256xi1>
    %208 = vector.broadcast %207 : vector<1x256xi1> to vector<8x256xi1>
    %209 = vector.broadcast %cst_59 : f32 to vector<8x256xf32>
    %210 = arith.select %208, %206, %209 : vector<8x256xi1>, vector<8x256xf32>
    %211 = vector.broadcast %205 : vector<8x1xf32> to vector<8x256xf32>
    %212 = arith.mulf %210, %211 : vector<8x256xf32>
    %213 = arith.addf %204, %212 : vector<8x256xf32>
    %214 = vector.extract_strided_slice %1 {offsets = [0, 42], sizes = [8, 1], strides = [1, 1]} : vector<8x85xf32> to vector<8x1xf32>
    %c239_i32 = arith.constant 239 : i32
    %215 = tpu.dynamic_rotate %80 by %c239_i32 dim 1 : vector<8x256xf32>, i32 -> vector<8x256xf32>
    %216 = arith.andi %100, %132 : vector<1x256xi1>
    %cst_60 = arith.constant 0.000000e+00 : f32
    %217 = vector.shape_cast %216 : vector<1x256xi1> to vector<1x256xi1>
    %218 = vector.broadcast %217 : vector<1x256xi1> to vector<8x256xi1>
    %219 = vector.broadcast %cst_60 : f32 to vector<8x256xf32>
    %220 = arith.select %218, %215, %219 : vector<8x256xi1>, vector<8x256xf32>
    %221 = vector.broadcast %214 : vector<8x1xf32> to vector<8x256xf32>
    %222 = arith.mulf %220, %221 : vector<8x256xf32>
    %223 = arith.addf %213, %222 : vector<8x256xf32>
    %224 = vector.extract_strided_slice %1 {offsets = [0, 27], sizes = [8, 1], strides = [1, 1]} : vector<8x85xf32> to vector<8x1xf32>
    %225 = vector.broadcast %224 : vector<8x1xf32> to vector<8x256xf32>
    %226 = arith.addf %223, %225 : vector<8x256xf32>
    %c4_i32_61 = arith.constant 4 : i32
    %227 = tpu.dynamic_rotate %226 by %c4_i32_61 dim 1 : vector<8x256xf32>, i32 -> vector<8x256xf32>
    %cst_62 = arith.constant 0.000000e+00 : f32
    %228 = vector.shape_cast %116 : vector<1x256xi1> to vector<1x256xi1>
    %229 = vector.broadcast %228 : vector<1x256xi1> to vector<8x256xi1>
    %230 = vector.broadcast %cst_62 : f32 to vector<8x256xf32>
    %231 = arith.select %229, %227, %230 : vector<8x256xi1>, vector<8x256xf32>
    %c3_i32_63 = arith.constant 3 : i32
    %232 = tpu.dynamic_rotate %226 by %c3_i32_63 dim 1 : vector<8x256xf32>, i32 -> vector<8x256xf32>
    %cst_64 = arith.constant 0.000000e+00 : f32
    %233 = vector.shape_cast %120 : vector<1x256xi1> to vector<1x256xi1>
    %234 = vector.broadcast %233 : vector<1x256xi1> to vector<8x256xi1>
    %235 = vector.broadcast %cst_64 : f32 to vector<8x256xf32>
    %236 = arith.select %234, %232, %235 : vector<8x256xi1>, vector<8x256xf32>
    %c2_i32_65 = arith.constant 2 : i32
    %237 = tpu.dynamic_rotate %226 by %c2_i32_65 dim 1 : vector<8x256xf32>, i32 -> vector<8x256xf32>
    %cst_66 = arith.constant 0.000000e+00 : f32
    %238 = vector.shape_cast %124 : vector<1x256xi1> to vector<1x256xi1>
    %239 = vector.broadcast %238 : vector<1x256xi1> to vector<8x256xi1>
    %240 = vector.broadcast %cst_66 : f32 to vector<8x256xf32>
    %241 = arith.select %239, %237, %240 : vector<8x256xi1>, vector<8x256xf32>
    %c1_i32_67 = arith.constant 1 : i32
    %242 = tpu.dynamic_rotate %226 by %c1_i32_67 dim 1 : vector<8x256xf32>, i32 -> vector<8x256xf32>
    %cst_68 = arith.constant 0.000000e+00 : f32
    %243 = vector.shape_cast %128 : vector<1x256xi1> to vector<1x256xi1>
    %244 = vector.broadcast %243 : vector<1x256xi1> to vector<8x256xi1>
    %245 = vector.broadcast %cst_68 : f32 to vector<8x256xf32>
    %246 = arith.select %244, %242, %245 : vector<8x256xi1>, vector<8x256xf32>
    %c255_i32_69 = arith.constant 255 : i32
    %247 = tpu.dynamic_rotate %226 by %c255_i32_69 dim 1 : vector<8x256xf32>, i32 -> vector<8x256xf32>
    %cst_70 = arith.constant 0.000000e+00 : f32
    %248 = vector.shape_cast %132 : vector<1x256xi1> to vector<1x256xi1>
    %249 = vector.broadcast %248 : vector<1x256xi1> to vector<8x256xi1>
    %250 = vector.broadcast %cst_70 : f32 to vector<8x256xf32>
    %251 = arith.select %249, %247, %250 : vector<8x256xi1>, vector<8x256xf32>
    %c254_i32 = arith.constant 254 : i32
    %252 = tpu.dynamic_rotate %226 by %c254_i32 dim 1 : vector<8x256xf32>, i32 -> vector<8x256xf32>
    %cst_71 = arith.constant 0.000000e+00 : f32
    %253 = vector.shape_cast %136 : vector<1x256xi1> to vector<1x256xi1>
    %254 = vector.broadcast %253 : vector<1x256xi1> to vector<8x256xi1>
    %255 = vector.broadcast %cst_71 : f32 to vector<8x256xf32>
    %256 = arith.select %254, %252, %255 : vector<8x256xi1>, vector<8x256xf32>
    %c253_i32 = arith.constant 253 : i32
    %257 = tpu.dynamic_rotate %226 by %c253_i32 dim 1 : vector<8x256xf32>, i32 -> vector<8x256xf32>
    %cst_72 = arith.constant 0.000000e+00 : f32
    %258 = vector.shape_cast %140 : vector<1x256xi1> to vector<1x256xi1>
    %259 = vector.broadcast %258 : vector<1x256xi1> to vector<8x256xi1>
    %260 = vector.broadcast %cst_72 : f32 to vector<8x256xf32>
    %261 = arith.select %259, %257, %260 : vector<8x256xi1>, vector<8x256xf32>
    %c252_i32 = arith.constant 252 : i32
    %262 = tpu.dynamic_rotate %226 by %c252_i32 dim 1 : vector<8x256xf32>, i32 -> vector<8x256xf32>
    %cst_73 = arith.constant 0.000000e+00 : f32
    %263 = vector.shape_cast %144 : vector<1x256xi1> to vector<1x256xi1>
    %264 = vector.broadcast %263 : vector<1x256xi1> to vector<8x256xi1>
    %265 = vector.broadcast %cst_73 : f32 to vector<8x256xf32>
    %266 = arith.select %264, %262, %265 : vector<8x256xi1>, vector<8x256xf32>
    %267 = vector.extract_strided_slice %1 {offsets = [0, 43], sizes = [8, 1], strides = [1, 1]} : vector<8x85xf32> to vector<8x1xf32>
    %268 = vector.broadcast %267 : vector<8x1xf32> to vector<8x256xf32>
    %269 = arith.mulf %241, %268 : vector<8x256xf32>
    %270 = vector.extract_strided_slice %1 {offsets = [0, 44], sizes = [8, 1], strides = [1, 1]} : vector<8x85xf32> to vector<8x1xf32>
    %271 = vector.broadcast %270 : vector<8x1xf32> to vector<8x256xf32>
    %272 = arith.mulf %246, %271 : vector<8x256xf32>
    %273 = arith.addf %269, %272 : vector<8x256xf32>
    %274 = vector.extract_strided_slice %1 {offsets = [0, 45], sizes = [8, 1], strides = [1, 1]} : vector<8x85xf32> to vector<8x1xf32>
    %275 = vector.broadcast %274 : vector<8x1xf32> to vector<8x256xf32>
    %276 = arith.mulf %226, %275 : vector<8x256xf32>
    %277 = arith.addf %273, %276 : vector<8x256xf32>
    %278 = vector.extract_strided_slice %1 {offsets = [0, 46], sizes = [8, 1], strides = [1, 1]} : vector<8x85xf32> to vector<8x1xf32>
    %279 = vector.broadcast %278 : vector<8x1xf32> to vector<8x256xf32>
    %280 = arith.mulf %251, %279 : vector<8x256xf32>
    %281 = arith.addf %277, %280 : vector<8x256xf32>
    %282 = vector.extract_strided_slice %1 {offsets = [0, 47], sizes = [8, 1], strides = [1, 1]} : vector<8x85xf32> to vector<8x1xf32>
    %283 = vector.broadcast %282 : vector<8x1xf32> to vector<8x256xf32>
    %284 = arith.mulf %256, %283 : vector<8x256xf32>
    %285 = arith.addf %281, %284 : vector<8x256xf32>
    %286 = vector.extract_strided_slice %1 {offsets = [0, 28], sizes = [8, 1], strides = [1, 1]} : vector<8x85xf32> to vector<8x1xf32>
    %287 = vector.broadcast %286 : vector<8x1xf32> to vector<8x256xf32>
    %288 = arith.addf %285, %287 : vector<8x256xf32>
    %289 = vector.extract_strided_slice %1 {offsets = [0, 48], sizes = [8, 1], strides = [1, 1]} : vector<8x85xf32> to vector<8x1xf32>
    %c32_i32 = arith.constant 32 : i32
    %290 = tpu.dynamic_rotate %288 by %c32_i32 dim 1 : vector<8x256xf32>, i32 -> vector<8x256xf32>
    %cst_74 = arith.constant 0.000000e+00 : f32
    %291 = vector.shape_cast %92 : vector<1x256xi1> to vector<1x256xi1>
    %292 = vector.broadcast %291 : vector<1x256xi1> to vector<8x256xi1>
    %293 = vector.broadcast %cst_74 : f32 to vector<8x256xf32>
    %294 = arith.select %292, %290, %293 : vector<8x256xi1>, vector<8x256xf32>
    %295 = vector.broadcast %289 : vector<8x1xf32> to vector<8x256xf32>
    %296 = arith.mulf %294, %295 : vector<8x256xf32>
    %297 = vector.extract_strided_slice %1 {offsets = [0, 49], sizes = [8, 1], strides = [1, 1]} : vector<8x85xf32> to vector<8x1xf32>
    %c16_i32_75 = arith.constant 16 : i32
    %298 = tpu.dynamic_rotate %288 by %c16_i32_75 dim 1 : vector<8x256xf32>, i32 -> vector<8x256xf32>
    %cst_76 = arith.constant 0.000000e+00 : f32
    %299 = vector.shape_cast %96 : vector<1x256xi1> to vector<1x256xi1>
    %300 = vector.broadcast %299 : vector<1x256xi1> to vector<8x256xi1>
    %301 = vector.broadcast %cst_76 : f32 to vector<8x256xf32>
    %302 = arith.select %300, %298, %301 : vector<8x256xi1>, vector<8x256xf32>
    %303 = vector.broadcast %297 : vector<8x1xf32> to vector<8x256xf32>
    %304 = arith.mulf %302, %303 : vector<8x256xf32>
    %305 = arith.addf %296, %304 : vector<8x256xf32>
    %306 = vector.extract_strided_slice %1 {offsets = [0, 50], sizes = [8, 1], strides = [1, 1]} : vector<8x85xf32> to vector<8x1xf32>
    %307 = vector.broadcast %306 : vector<8x1xf32> to vector<8x256xf32>
    %308 = arith.mulf %288, %307 : vector<8x256xf32>
    %309 = arith.addf %305, %308 : vector<8x256xf32>
    %310 = vector.extract_strided_slice %1 {offsets = [0, 51], sizes = [8, 1], strides = [1, 1]} : vector<8x85xf32> to vector<8x1xf32>
    %c240_i32_77 = arith.constant 240 : i32
    %311 = tpu.dynamic_rotate %288 by %c240_i32_77 dim 1 : vector<8x256xf32>, i32 -> vector<8x256xf32>
    %cst_78 = arith.constant 0.000000e+00 : f32
    %312 = vector.shape_cast %100 : vector<1x256xi1> to vector<1x256xi1>
    %313 = vector.broadcast %312 : vector<1x256xi1> to vector<8x256xi1>
    %314 = vector.broadcast %cst_78 : f32 to vector<8x256xf32>
    %315 = arith.select %313, %311, %314 : vector<8x256xi1>, vector<8x256xf32>
    %316 = vector.broadcast %310 : vector<8x1xf32> to vector<8x256xf32>
    %317 = arith.mulf %315, %316 : vector<8x256xf32>
    %318 = arith.addf %309, %317 : vector<8x256xf32>
    %319 = vector.extract_strided_slice %1 {offsets = [0, 52], sizes = [8, 1], strides = [1, 1]} : vector<8x85xf32> to vector<8x1xf32>
    %c224_i32 = arith.constant 224 : i32
    %320 = tpu.dynamic_rotate %288 by %c224_i32 dim 1 : vector<8x256xf32>, i32 -> vector<8x256xf32>
    %cst_79 = arith.constant 0.000000e+00 : f32
    %321 = vector.shape_cast %104 : vector<1x256xi1> to vector<1x256xi1>
    %322 = vector.broadcast %321 : vector<1x256xi1> to vector<8x256xi1>
    %323 = vector.broadcast %cst_79 : f32 to vector<8x256xf32>
    %324 = arith.select %322, %320, %323 : vector<8x256xi1>, vector<8x256xf32>
    %325 = vector.broadcast %319 : vector<8x1xf32> to vector<8x256xf32>
    %326 = arith.mulf %324, %325 : vector<8x256xf32>
    %327 = arith.addf %318, %326 : vector<8x256xf32>
    %328 = vector.extract_strided_slice %1 {offsets = [0, 29], sizes = [8, 1], strides = [1, 1]} : vector<8x85xf32> to vector<8x1xf32>
    %329 = vector.broadcast %328 : vector<8x1xf32> to vector<8x256xf32>
    %330 = arith.addf %327, %329 : vector<8x256xf32>
    %331 = arith.addf %226, %330 : vector<8x256xf32>
    %332 = vector.extract_strided_slice %1 {offsets = [0, 53], sizes = [8, 1], strides = [1, 1]} : vector<8x85xf32> to vector<8x1xf32>
    %333 = vector.broadcast %332 : vector<8x1xf32> to vector<8x256xf32>
    %334 = arith.mulf %236, %333 : vector<8x256xf32>
    %335 = vector.extract_strided_slice %1 {offsets = [0, 54], sizes = [8, 1], strides = [1, 1]} : vector<8x85xf32> to vector<8x1xf32>
    %336 = vector.broadcast %335 : vector<8x1xf32> to vector<8x256xf32>
    %337 = arith.mulf %241, %336 : vector<8x256xf32>
    %338 = arith.addf %334, %337 : vector<8x256xf32>
    %339 = vector.extract_strided_slice %1 {offsets = [0, 55], sizes = [8, 1], strides = [1, 1]} : vector<8x85xf32> to vector<8x1xf32>
    %340 = vector.broadcast %339 : vector<8x1xf32> to vector<8x256xf32>
    %341 = arith.mulf %246, %340 : vector<8x256xf32>
    %342 = arith.addf %338, %341 : vector<8x256xf32>
    %343 = vector.extract_strided_slice %1 {offsets = [0, 56], sizes = [8, 1], strides = [1, 1]} : vector<8x85xf32> to vector<8x1xf32>
    %344 = vector.broadcast %343 : vector<8x1xf32> to vector<8x256xf32>
    %345 = arith.mulf %226, %344 : vector<8x256xf32>
    %346 = arith.addf %342, %345 : vector<8x256xf32>
    %347 = vector.extract_strided_slice %1 {offsets = [0, 57], sizes = [8, 1], strides = [1, 1]} : vector<8x85xf32> to vector<8x1xf32>
    %348 = vector.broadcast %347 : vector<8x1xf32> to vector<8x256xf32>
    %349 = arith.mulf %251, %348 : vector<8x256xf32>
    %350 = arith.addf %346, %349 : vector<8x256xf32>
    %351 = vector.extract_strided_slice %1 {offsets = [0, 58], sizes = [8, 1], strides = [1, 1]} : vector<8x85xf32> to vector<8x1xf32>
    %352 = vector.broadcast %351 : vector<8x1xf32> to vector<8x256xf32>
    %353 = arith.mulf %256, %352 : vector<8x256xf32>
    %354 = arith.addf %350, %353 : vector<8x256xf32>
    %355 = vector.extract_strided_slice %1 {offsets = [0, 59], sizes = [8, 1], strides = [1, 1]} : vector<8x85xf32> to vector<8x1xf32>
    %356 = vector.broadcast %355 : vector<8x1xf32> to vector<8x256xf32>
    %357 = arith.mulf %261, %356 : vector<8x256xf32>
    %358 = arith.addf %354, %357 : vector<8x256xf32>
    %359 = vector.extract_strided_slice %1 {offsets = [0, 30], sizes = [8, 1], strides = [1, 1]} : vector<8x85xf32> to vector<8x1xf32>
    %360 = vector.broadcast %359 : vector<8x1xf32> to vector<8x256xf32>
    %361 = arith.addf %358, %360 : vector<8x256xf32>
    %362 = vector.extract_strided_slice %1 {offsets = [0, 60], sizes = [8, 1], strides = [1, 1]} : vector<8x85xf32> to vector<8x1xf32>
    %c48_i32 = arith.constant 48 : i32
    %363 = tpu.dynamic_rotate %361 by %c48_i32 dim 1 : vector<8x256xf32>, i32 -> vector<8x256xf32>
    %cst_80 = arith.constant 0.000000e+00 : f32
    %364 = vector.shape_cast %88 : vector<1x256xi1> to vector<1x256xi1>
    %365 = vector.broadcast %364 : vector<1x256xi1> to vector<8x256xi1>
    %366 = vector.broadcast %cst_80 : f32 to vector<8x256xf32>
    %367 = arith.select %365, %363, %366 : vector<8x256xi1>, vector<8x256xf32>
    %368 = vector.broadcast %362 : vector<8x1xf32> to vector<8x256xf32>
    %369 = arith.mulf %367, %368 : vector<8x256xf32>
    %370 = vector.extract_strided_slice %1 {offsets = [0, 61], sizes = [8, 1], strides = [1, 1]} : vector<8x85xf32> to vector<8x1xf32>
    %c32_i32_81 = arith.constant 32 : i32
    %371 = tpu.dynamic_rotate %361 by %c32_i32_81 dim 1 : vector<8x256xf32>, i32 -> vector<8x256xf32>
    %cst_82 = arith.constant 0.000000e+00 : f32
    %372 = vector.shape_cast %92 : vector<1x256xi1> to vector<1x256xi1>
    %373 = vector.broadcast %372 : vector<1x256xi1> to vector<8x256xi1>
    %374 = vector.broadcast %cst_82 : f32 to vector<8x256xf32>
    %375 = arith.select %373, %371, %374 : vector<8x256xi1>, vector<8x256xf32>
    %376 = vector.broadcast %370 : vector<8x1xf32> to vector<8x256xf32>
    %377 = arith.mulf %375, %376 : vector<8x256xf32>
    %378 = arith.addf %369, %377 : vector<8x256xf32>
    %379 = vector.extract_strided_slice %1 {offsets = [0, 62], sizes = [8, 1], strides = [1, 1]} : vector<8x85xf32> to vector<8x1xf32>
    %c16_i32_83 = arith.constant 16 : i32
    %380 = tpu.dynamic_rotate %361 by %c16_i32_83 dim 1 : vector<8x256xf32>, i32 -> vector<8x256xf32>
    %cst_84 = arith.constant 0.000000e+00 : f32
    %381 = vector.shape_cast %96 : vector<1x256xi1> to vector<1x256xi1>
    %382 = vector.broadcast %381 : vector<1x256xi1> to vector<8x256xi1>
    %383 = vector.broadcast %cst_84 : f32 to vector<8x256xf32>
    %384 = arith.select %382, %380, %383 : vector<8x256xi1>, vector<8x256xf32>
    %385 = vector.broadcast %379 : vector<8x1xf32> to vector<8x256xf32>
    %386 = arith.mulf %384, %385 : vector<8x256xf32>
    %387 = arith.addf %378, %386 : vector<8x256xf32>
    %388 = vector.extract_strided_slice %1 {offsets = [0, 63], sizes = [8, 1], strides = [1, 1]} : vector<8x85xf32> to vector<8x1xf32>
    %389 = vector.broadcast %388 : vector<8x1xf32> to vector<8x256xf32>
    %390 = arith.mulf %361, %389 : vector<8x256xf32>
    %391 = arith.addf %387, %390 : vector<8x256xf32>
    %392 = vector.extract_strided_slice %1 {offsets = [0, 64], sizes = [8, 1], strides = [1, 1]} : vector<8x85xf32> to vector<8x1xf32>
    %c240_i32_85 = arith.constant 240 : i32
    %393 = tpu.dynamic_rotate %361 by %c240_i32_85 dim 1 : vector<8x256xf32>, i32 -> vector<8x256xf32>
    %cst_86 = arith.constant 0.000000e+00 : f32
    %394 = vector.shape_cast %100 : vector<1x256xi1> to vector<1x256xi1>
    %395 = vector.broadcast %394 : vector<1x256xi1> to vector<8x256xi1>
    %396 = vector.broadcast %cst_86 : f32 to vector<8x256xf32>
    %397 = arith.select %395, %393, %396 : vector<8x256xi1>, vector<8x256xf32>
    %398 = vector.broadcast %392 : vector<8x1xf32> to vector<8x256xf32>
    %399 = arith.mulf %397, %398 : vector<8x256xf32>
    %400 = arith.addf %391, %399 : vector<8x256xf32>
    %401 = vector.extract_strided_slice %1 {offsets = [0, 65], sizes = [8, 1], strides = [1, 1]} : vector<8x85xf32> to vector<8x1xf32>
    %c224_i32_87 = arith.constant 224 : i32
    %402 = tpu.dynamic_rotate %361 by %c224_i32_87 dim 1 : vector<8x256xf32>, i32 -> vector<8x256xf32>
    %cst_88 = arith.constant 0.000000e+00 : f32
    %403 = vector.shape_cast %104 : vector<1x256xi1> to vector<1x256xi1>
    %404 = vector.broadcast %403 : vector<1x256xi1> to vector<8x256xi1>
    %405 = vector.broadcast %cst_88 : f32 to vector<8x256xf32>
    %406 = arith.select %404, %402, %405 : vector<8x256xi1>, vector<8x256xf32>
    %407 = vector.broadcast %401 : vector<8x1xf32> to vector<8x256xf32>
    %408 = arith.mulf %406, %407 : vector<8x256xf32>
    %409 = arith.addf %400, %408 : vector<8x256xf32>
    %410 = vector.extract_strided_slice %1 {offsets = [0, 66], sizes = [8, 1], strides = [1, 1]} : vector<8x85xf32> to vector<8x1xf32>
    %c208_i32 = arith.constant 208 : i32
    %411 = tpu.dynamic_rotate %361 by %c208_i32 dim 1 : vector<8x256xf32>, i32 -> vector<8x256xf32>
    %cst_89 = arith.constant 0.000000e+00 : f32
    %412 = vector.shape_cast %108 : vector<1x256xi1> to vector<1x256xi1>
    %413 = vector.broadcast %412 : vector<1x256xi1> to vector<8x256xi1>
    %414 = vector.broadcast %cst_89 : f32 to vector<8x256xf32>
    %415 = arith.select %413, %411, %414 : vector<8x256xi1>, vector<8x256xf32>
    %416 = vector.broadcast %410 : vector<8x1xf32> to vector<8x256xf32>
    %417 = arith.mulf %415, %416 : vector<8x256xf32>
    %418 = arith.addf %409, %417 : vector<8x256xf32>
    %419 = vector.extract_strided_slice %1 {offsets = [0, 31], sizes = [8, 1], strides = [1, 1]} : vector<8x85xf32> to vector<8x1xf32>
    %420 = vector.broadcast %419 : vector<8x1xf32> to vector<8x256xf32>
    %421 = arith.addf %418, %420 : vector<8x256xf32>
    %422 = arith.addf %331, %421 : vector<8x256xf32>
    %423 = vector.extract_strided_slice %1 {offsets = [0, 67], sizes = [8, 1], strides = [1, 1]} : vector<8x85xf32> to vector<8x1xf32>
    %424 = vector.broadcast %423 : vector<8x1xf32> to vector<8x256xf32>
    %425 = arith.mulf %231, %424 : vector<8x256xf32>
    %426 = vector.extract_strided_slice %1 {offsets = [0, 68], sizes = [8, 1], strides = [1, 1]} : vector<8x85xf32> to vector<8x1xf32>
    %427 = vector.broadcast %426 : vector<8x1xf32> to vector<8x256xf32>
    %428 = arith.mulf %236, %427 : vector<8x256xf32>
    %429 = arith.addf %425, %428 : vector<8x256xf32>
    %430 = vector.extract_strided_slice %1 {offsets = [0, 69], sizes = [8, 1], strides = [1, 1]} : vector<8x85xf32> to vector<8x1xf32>
    %431 = vector.broadcast %430 : vector<8x1xf32> to vector<8x256xf32>
    %432 = arith.mulf %241, %431 : vector<8x256xf32>
    %433 = arith.addf %429, %432 : vector<8x256xf32>
    %434 = vector.extract_strided_slice %1 {offsets = [0, 70], sizes = [8, 1], strides = [1, 1]} : vector<8x85xf32> to vector<8x1xf32>
    %435 = vector.broadcast %434 : vector<8x1xf32> to vector<8x256xf32>
    %436 = arith.mulf %246, %435 : vector<8x256xf32>
    %437 = arith.addf %433, %436 : vector<8x256xf32>
    %438 = vector.extract_strided_slice %1 {offsets = [0, 71], sizes = [8, 1], strides = [1, 1]} : vector<8x85xf32> to vector<8x1xf32>
    %439 = vector.broadcast %438 : vector<8x1xf32> to vector<8x256xf32>
    %440 = arith.mulf %226, %439 : vector<8x256xf32>
    %441 = arith.addf %437, %440 : vector<8x256xf32>
    %442 = vector.extract_strided_slice %1 {offsets = [0, 72], sizes = [8, 1], strides = [1, 1]} : vector<8x85xf32> to vector<8x1xf32>
    %443 = vector.broadcast %442 : vector<8x1xf32> to vector<8x256xf32>
    %444 = arith.mulf %251, %443 : vector<8x256xf32>
    %445 = arith.addf %441, %444 : vector<8x256xf32>
    %446 = vector.extract_strided_slice %1 {offsets = [0, 73], sizes = [8, 1], strides = [1, 1]} : vector<8x85xf32> to vector<8x1xf32>
    %447 = vector.broadcast %446 : vector<8x1xf32> to vector<8x256xf32>
    %448 = arith.mulf %256, %447 : vector<8x256xf32>
    %449 = arith.addf %445, %448 : vector<8x256xf32>
    %450 = vector.extract_strided_slice %1 {offsets = [0, 74], sizes = [8, 1], strides = [1, 1]} : vector<8x85xf32> to vector<8x1xf32>
    %451 = vector.broadcast %450 : vector<8x1xf32> to vector<8x256xf32>
    %452 = arith.mulf %261, %451 : vector<8x256xf32>
    %453 = arith.addf %449, %452 : vector<8x256xf32>
    %454 = vector.extract_strided_slice %1 {offsets = [0, 75], sizes = [8, 1], strides = [1, 1]} : vector<8x85xf32> to vector<8x1xf32>
    %455 = vector.broadcast %454 : vector<8x1xf32> to vector<8x256xf32>
    %456 = arith.mulf %266, %455 : vector<8x256xf32>
    %457 = arith.addf %453, %456 : vector<8x256xf32>
    %458 = vector.extract_strided_slice %1 {offsets = [0, 32], sizes = [8, 1], strides = [1, 1]} : vector<8x85xf32> to vector<8x1xf32>
    %459 = vector.broadcast %458 : vector<8x1xf32> to vector<8x256xf32>
    %460 = arith.addf %457, %459 : vector<8x256xf32>
    %461 = vector.extract_strided_slice %1 {offsets = [0, 76], sizes = [8, 1], strides = [1, 1]} : vector<8x85xf32> to vector<8x1xf32>
    %c64_i32 = arith.constant 64 : i32
    %462 = tpu.dynamic_rotate %460 by %c64_i32 dim 1 : vector<8x256xf32>, i32 -> vector<8x256xf32>
    %cst_90 = arith.constant 0.000000e+00 : f32
    %463 = vector.shape_cast %84 : vector<1x256xi1> to vector<1x256xi1>
    %464 = vector.broadcast %463 : vector<1x256xi1> to vector<8x256xi1>
    %465 = vector.broadcast %cst_90 : f32 to vector<8x256xf32>
    %466 = arith.select %464, %462, %465 : vector<8x256xi1>, vector<8x256xf32>
    %467 = vector.broadcast %461 : vector<8x1xf32> to vector<8x256xf32>
    %468 = arith.mulf %466, %467 : vector<8x256xf32>
    %469 = vector.extract_strided_slice %1 {offsets = [0, 77], sizes = [8, 1], strides = [1, 1]} : vector<8x85xf32> to vector<8x1xf32>
    %c48_i32_91 = arith.constant 48 : i32
    %470 = tpu.dynamic_rotate %460 by %c48_i32_91 dim 1 : vector<8x256xf32>, i32 -> vector<8x256xf32>
    %cst_92 = arith.constant 0.000000e+00 : f32
    %471 = vector.shape_cast %88 : vector<1x256xi1> to vector<1x256xi1>
    %472 = vector.broadcast %471 : vector<1x256xi1> to vector<8x256xi1>
    %473 = vector.broadcast %cst_92 : f32 to vector<8x256xf32>
    %474 = arith.select %472, %470, %473 : vector<8x256xi1>, vector<8x256xf32>
    %475 = vector.broadcast %469 : vector<8x1xf32> to vector<8x256xf32>
    %476 = arith.mulf %474, %475 : vector<8x256xf32>
    %477 = arith.addf %468, %476 : vector<8x256xf32>
    %478 = vector.extract_strided_slice %1 {offsets = [0, 78], sizes = [8, 1], strides = [1, 1]} : vector<8x85xf32> to vector<8x1xf32>
    %c32_i32_93 = arith.constant 32 : i32
    %479 = tpu.dynamic_rotate %460 by %c32_i32_93 dim 1 : vector<8x256xf32>, i32 -> vector<8x256xf32>
    %cst_94 = arith.constant 0.000000e+00 : f32
    %480 = vector.shape_cast %92 : vector<1x256xi1> to vector<1x256xi1>
    %481 = vector.broadcast %480 : vector<1x256xi1> to vector<8x256xi1>
    %482 = vector.broadcast %cst_94 : f32 to vector<8x256xf32>
    %483 = arith.select %481, %479, %482 : vector<8x256xi1>, vector<8x256xf32>
    %484 = vector.broadcast %478 : vector<8x1xf32> to vector<8x256xf32>
    %485 = arith.mulf %483, %484 : vector<8x256xf32>
    %486 = arith.addf %477, %485 : vector<8x256xf32>
    %487 = vector.extract_strided_slice %1 {offsets = [0, 79], sizes = [8, 1], strides = [1, 1]} : vector<8x85xf32> to vector<8x1xf32>
    %c16_i32_95 = arith.constant 16 : i32
    %488 = tpu.dynamic_rotate %460 by %c16_i32_95 dim 1 : vector<8x256xf32>, i32 -> vector<8x256xf32>
    %cst_96 = arith.constant 0.000000e+00 : f32
    %489 = vector.shape_cast %96 : vector<1x256xi1> to vector<1x256xi1>
    %490 = vector.broadcast %489 : vector<1x256xi1> to vector<8x256xi1>
    %491 = vector.broadcast %cst_96 : f32 to vector<8x256xf32>
    %492 = arith.select %490, %488, %491 : vector<8x256xi1>, vector<8x256xf32>
    %493 = vector.broadcast %487 : vector<8x1xf32> to vector<8x256xf32>
    %494 = arith.mulf %492, %493 : vector<8x256xf32>
    %495 = arith.addf %486, %494 : vector<8x256xf32>
    %496 = vector.extract_strided_slice %1 {offsets = [0, 80], sizes = [8, 1], strides = [1, 1]} : vector<8x85xf32> to vector<8x1xf32>
    %497 = vector.broadcast %496 : vector<8x1xf32> to vector<8x256xf32>
    %498 = arith.mulf %460, %497 : vector<8x256xf32>
    %499 = arith.addf %495, %498 : vector<8x256xf32>
    %500 = vector.extract_strided_slice %1 {offsets = [0, 81], sizes = [8, 1], strides = [1, 1]} : vector<8x85xf32> to vector<8x1xf32>
    %c240_i32_97 = arith.constant 240 : i32
    %501 = tpu.dynamic_rotate %460 by %c240_i32_97 dim 1 : vector<8x256xf32>, i32 -> vector<8x256xf32>
    %cst_98 = arith.constant 0.000000e+00 : f32
    %502 = vector.shape_cast %100 : vector<1x256xi1> to vector<1x256xi1>
    %503 = vector.broadcast %502 : vector<1x256xi1> to vector<8x256xi1>
    %504 = vector.broadcast %cst_98 : f32 to vector<8x256xf32>
    %505 = arith.select %503, %501, %504 : vector<8x256xi1>, vector<8x256xf32>
    %506 = vector.broadcast %500 : vector<8x1xf32> to vector<8x256xf32>
    %507 = arith.mulf %505, %506 : vector<8x256xf32>
    %508 = arith.addf %499, %507 : vector<8x256xf32>
    %509 = vector.extract_strided_slice %1 {offsets = [0, 82], sizes = [8, 1], strides = [1, 1]} : vector<8x85xf32> to vector<8x1xf32>
    %c224_i32_99 = arith.constant 224 : i32
    %510 = tpu.dynamic_rotate %460 by %c224_i32_99 dim 1 : vector<8x256xf32>, i32 -> vector<8x256xf32>
    %cst_100 = arith.constant 0.000000e+00 : f32
    %511 = vector.shape_cast %104 : vector<1x256xi1> to vector<1x256xi1>
    %512 = vector.broadcast %511 : vector<1x256xi1> to vector<8x256xi1>
    %513 = vector.broadcast %cst_100 : f32 to vector<8x256xf32>
    %514 = arith.select %512, %510, %513 : vector<8x256xi1>, vector<8x256xf32>
    %515 = vector.broadcast %509 : vector<8x1xf32> to vector<8x256xf32>
    %516 = arith.mulf %514, %515 : vector<8x256xf32>
    %517 = arith.addf %508, %516 : vector<8x256xf32>
    %518 = vector.extract_strided_slice %1 {offsets = [0, 83], sizes = [8, 1], strides = [1, 1]} : vector<8x85xf32> to vector<8x1xf32>
    %c208_i32_101 = arith.constant 208 : i32
    %519 = tpu.dynamic_rotate %460 by %c208_i32_101 dim 1 : vector<8x256xf32>, i32 -> vector<8x256xf32>
    %cst_102 = arith.constant 0.000000e+00 : f32
    %520 = vector.shape_cast %108 : vector<1x256xi1> to vector<1x256xi1>
    %521 = vector.broadcast %520 : vector<1x256xi1> to vector<8x256xi1>
    %522 = vector.broadcast %cst_102 : f32 to vector<8x256xf32>
    %523 = arith.select %521, %519, %522 : vector<8x256xi1>, vector<8x256xf32>
    %524 = vector.broadcast %518 : vector<8x1xf32> to vector<8x256xf32>
    %525 = arith.mulf %523, %524 : vector<8x256xf32>
    %526 = arith.addf %517, %525 : vector<8x256xf32>
    %527 = vector.extract_strided_slice %1 {offsets = [0, 84], sizes = [8, 1], strides = [1, 1]} : vector<8x85xf32> to vector<8x1xf32>
    %c192_i32 = arith.constant 192 : i32
    %528 = tpu.dynamic_rotate %460 by %c192_i32 dim 1 : vector<8x256xf32>, i32 -> vector<8x256xf32>
    %cst_103 = arith.constant 0.000000e+00 : f32
    %529 = vector.shape_cast %112 : vector<1x256xi1> to vector<1x256xi1>
    %530 = vector.broadcast %529 : vector<1x256xi1> to vector<8x256xi1>
    %531 = vector.broadcast %cst_103 : f32 to vector<8x256xf32>
    %532 = arith.select %530, %528, %531 : vector<8x256xi1>, vector<8x256xf32>
    %533 = vector.broadcast %527 : vector<8x1xf32> to vector<8x256xf32>
    %534 = arith.mulf %532, %533 : vector<8x256xf32>
    %535 = arith.addf %526, %534 : vector<8x256xf32>
    %536 = vector.extract_strided_slice %1 {offsets = [0, 33], sizes = [8, 1], strides = [1, 1]} : vector<8x85xf32> to vector<8x1xf32>
    %537 = vector.broadcast %536 : vector<8x1xf32> to vector<8x256xf32>
    %538 = arith.addf %535, %537 : vector<8x256xf32>
    %539 = arith.addf %422, %538 : vector<8x256xf32>
    %cst_104 = arith.constant dense<0.000000e+00> : vector<8x256xf32>
    %540 = tpu.matmul %5, %539, %cst_104 {dimension_numbers = #tpu.dot_dimension_numbers<[1], [0], [0], [1], [0, 0, 1, 1], [], []>} : vector<8x8xf32>, vector<8x256xf32>, vector<8x256xf32> -> vector<8x256xf32>
    %541 = vector.broadcast %8 : vector<8x1xf32> to vector<8x256xf32>
    %542 = arith.addf %540, %541 : vector<8x256xf32>
    %543 = arith.mulf %542, %80 : vector<8x256xf32>
    %cst_105 = arith.constant dense<0.000000e+00> : vector<8x256xf32>
    %544 = tpu.matmul %5, %543, %cst_105 {dimension_numbers = #tpu.dot_dimension_numbers<[1], [0], [0], [1], [0, 0, 1, 1], [], []>} : vector<8x8xf32>, vector<8x256xf32>, vector<8x256xf32> -> vector<8x256xf32>
    %545 = vector.broadcast %8 : vector<8x1xf32> to vector<8x256xf32>
    %546 = arith.addf %544, %545 : vector<8x256xf32>
    %c0_106 = arith.constant 0 : index
    %c0_107 = arith.constant 0 : index
    %547 = vector.load %arg4[%c0_106, %c0_107] : memref<8x256xf32, #tpu.memory_space<vmem>>, vector<8x256xf32>
    tpu.vector_store %arg4[%c0_106, %c0_107], %546 {strides = array<i32>} : memref<8x256xf32, #tpu.memory_space<vmem>>, vector<8x256xf32>,
    return
  }
  func.func @transform_0(%arg0: i32) -> (i32, i32) {
    %c0_i32 = arith.constant 0 : i32
    %c0_i32_0 = arith.constant 0 : i32
    return %c0_i32, %arg0 : i32, i32
  }
  func.func @transform_1(%arg0: i32) -> (i32, i32) {
    %c0_i32 = arith.constant 0 : i32
    %c0_i32_0 = arith.constant 0 : i32
    %c0_i32_1 = arith.constant 0 : i32
    return %c0_i32, %c0_i32_0 : i32, i32
  }
  func.func @transform_2(%arg0: i32) -> (i32, i32) {
    %c0_i32 = arith.constant 0 : i32
    %c0_i32_0 = arith.constant 0 : i32
    %c0_i32_1 = arith.constant 0 : i32
    return %c0_i32, %c0_i32_0 : i32, i32
  }
  func.func @transform_3(%arg0: i32) -> (i32, i32) {
    %c0_i32 = arith.constant 0 : i32
    %c0_i32_0 = arith.constant 0 : i32
    return %c0_i32, %arg0 : i32, i32
  }
}

</mosaic_0001>

<bundles_post_ra>
// kernel: repblock_pallas.1
= control target key start
LH: loop header
LB: loop body
LE: loop exit
PB: predicated region body
PF: predicated region fallthrough
CT: control target
= control target key end

     0   :  { %s2136_s12 = smov 0   ;;  %s3241_s0 = inlined_call_operand.vmem [shape: f32[8,512], index: 0, kind: input, shape index: {}]   ;;  %s3242_s1 = inlined_call_operand.vmem [shape: f32[8,85], index: 1, kind: input, shape index: {}]   ;;  %s3243_s2 = inlined_call_operand.vmem [shape: s32[2,256], index: 2, kind: input, shape index: {}]   ;;  %s3244_s3 = inlined_call_operand.vmem [shape: f32[8,512], index: 3, kind: output, shape index: {}]  }
   0x1 LB: > { %s1824_s13 = sadd.s32 4294967295, %s2030_s12   ;;  %p1828_p0 = scmp.ge.s32.totalorder %s2030_s12, 1  ;;  %s2030_s12 = sphi %s2136_s12, %s13_s12  }
   0x2   : > { %p138_p1 = scmp.lt.s32.totalorder %s2030_s12, 3 }
   0x4   : > { %p139_p2 = pnand %p1828_p0, %p138_p1 }
   0x6   : > { %142 = sbr.rel (%p139_p2) target bundleno = 2129 (0x851), region = 32 }
   0xd   : > { %s1829_s14 = sshll.u32 %s1824_s13, 1  ;;  %v2032_v0 = vmov 0.0   ;;  %v2148_v1 = vld [vmem:[%s3242_s1] sm:$0xff]  ;;  %v2033_v2 = vmov 24   ;;  %vm3265_vm0 = vcmask 64512   ;;  %vm2034_vm3 = vmmov 0  }
   0xe   : > { %p163_p3 = scmp.lt.s32.totalorder %s1829_s14, 3  ;;  %250 = vmatprep.mubr.f32.mxu0 %v2032_v0  ;;  %1948 = vset.pattern.permute.xlu0 %v2033_v2  ;;  %s2035_s21 = smov 120   ;;  %v2036_v62 = vmov 25   ;;  %vm318_vm4 = vcmask 7168  }
   0xf   : > { %180 = vperm.xlu0 %1948, %v2148_v1   ;;  %1846 = vmatprep.subr.mxu1 %v2032_v0  ;;  %s2037_s22 = smov 112   ;;  %s2048_s23 = smov 127  }
  0x10   : > { %s3368_s14 = smov (!%p163_p3, %s1829_s14), 3  ;;  %1848 = vmatprep.mubr.msk.f32.mxu1 %vm2034_vm3, %v2032_v0  ;;  %1949 = vset.pattern.permute.xlu1 %v2036_v62  ;;  %v2073_v62 = vmov 47   ;;  %s2075_s24 = smov 17  }
  0x11   : > { %s1830_s17 = sshll.u32 %s3368_s14, 3  ;;  %s2076_s25 = smov 113  }
  0x12   : > { %s166_s20 = scalar_lea.vmem %s3241_s0, %s1830_s17  ;;  %s2077_s26 = smov 16  }
  0x13   : > { %v175_v3 = vld [vmem:[%s166_s20 + $0x8] sm:$0xff]  ;;  %v174_v4 = vld [vmem:[%s166_s20] sm:$0xff]  ;;  %s2078_s27 = smov 15   ;;  %s2079_s28 = smov 1  }
  0x14   : > { %186 = vmatprep.subr.mxu0 %v175_v3  ;;  %s2091_s29 = smov 111   ;;  %s2101_s5 = smov 3  }
  0x15   : > { %187 = vmatpush1.msra.mxu0 %v174_v4  ;;  %s2102_s6 = smov 4   ;;  %s2103_s7 = smov 2  }
  0x16   : > { %1833 = vmatmul.mubr.msk.f32.vlgmr.msra.gmra.mrb[0].mxu0 %vm3265_vm0, %v2148_v1  ;;  %1851 = vmatprep.subr.mxu0 %v2032_v0  ;;  %s2104_s8 = smov 126   ;;  %s2105_s9 = smov 124  }
  0x17   : > { %1853 = vmatprep.mubr.msk.f32.mxu0 %vm2034_vm3, %v2032_v0  ;;  %s2106_s13 = smov 125   ;;  %s2111_s15 = smov 32  }
  0x18   : > { %s2112_s16 = smov 96   ;;  %s2113_s18 = smov 48  }
  0x19   : > { %s2114_s19 = smov 80   ;;  %s2115_s20 = smov 64  }
  0x8e   : > { %v2163_v5 = vpop.permute.xlu0 %180 }
  0x8f   : > { %3288 = vst [vmem:[#allocation2_spill] sm:$0xff] %v2163_v5 }
  0xe9   : > { %v252_v6 = vpop.f32.mrb[0].mxu0 }
  0xea   : > { %v253_v7 = vadd.f32 %v252_v6, %v2163_v5  ;;  %v254_v8 = vpop.f32.mrb[1].mxu0 }
  0xeb   : > { %v255_v9 = vadd.f32 %v254_v8, %v2163_v5 }
  0xec   : > { %v259_v10 = vmul.f32 0.70710677, %v253_v7  ;;  %v257_v53 = vmul.f32 0.5, %v253_v7  ;;  %v2038_v7 = vmov 26  }
  0xed   : > { %v260_v11 = vmul.f32 0.70710677, %v255_v9  ;;  %v258_v56 = vmul.f32 0.5, %v255_v9 }
  0xee   : > { %v261_v12 = vand.u32 2147483647, %v259_v10  ;;  %vm301_vm1 = vcmp.ge.f32.partialorder %v259_v10, 0.0 }
  0xef   : > { %v262_v13 = vand.u32 2147483647, %v260_v11  ;;  %vm302_vm2 = vcmp.ge.f32.partialorder %v260_v11, 0.0 }
  0xf0   : > { %v263_v14 = vmul.f32 0.3275911, %v261_v12  ;;  %v289_v18 = vsub.f32 0.0, %v261_v12 }
  0xf1   : > { %v264_v15 = vmul.f32 0.3275911, %v262_v13  ;;  %v290_v19 = vsub.f32 0.0, %v262_v13 }
  0xf2   : > { %v265_v16 = vadd.f32 1.0, %v263_v14  ;;  %v291_v21 = vmul.f32 %v289_v18, %v261_v12  ;;  %v2039_v14 = vmov 34   ;;  %v2043_v18 = vmov 37  }
  0xf3   : > { %v266_v17 = vadd.f32 1.0, %v264_v15  ;;  %v292_v23 = vmul.f32 %v290_v19, %v262_v13  ;;  %v2040_v15 = vmov 35   ;;  %v2044_v19 = vmov 40  }
  0xf4   : > { %2010 = vrcp.f32 %v265_v16  ;;  %v293_v27 = vmul.f32 1.442695, %v291_v21  ;;  %v2041_v16 = vmov 36  }
  0xf5   : > { %2012 = vrcp.f32 %v266_v17  ;;  %v295_v29 = vmul.f32 1.442695, %v292_v23  ;;  %v2042_v17 = vmov 39  }
  0xf6   : > { %2014 = vpow2.f32 %v293_v27  ;;  %1956 = vset.pattern.permute.xlu0 %v2042_v17 }
  0xf7   : > { %2016 = vpow2.f32 %v295_v29  ;;  %v3249_v29 = vmov 0  }
  0xfe   : > { %v2011_v20 = vpop.eup %2010 }
  0xff   : > { %v2013_v22 = vpop.eup %2012  ;;  %v271_v24 = vmul.f32 1.0614054, %v2011_v20 }
 0x100   : > { %v272_v25 = vmul.f32 1.0614054, %v2013_v22  ;;  %v2015_v43 = vpop.eup %2014 }
 0x101   : > { %v273_v26 = vadd.f32 -1.4531521, %v271_v24  ;;  %v2017_v45 = vpop.eup %2016 }
 0x102   : > { %v274_v28 = vadd.f32 -1.4531521, %v272_v25 }
 0x103   : > { %v275_v30 = vmul.f32 %v2011_v20, %v273_v26 }
 0x104   : > { %v276_v31 = vmul.f32 %v2013_v22, %v274_v28 }
 0x105   : > { %v277_v32 = vadd.f32 1.4214138, %v275_v30 }
 0x106   : > { %v278_v33 = vadd.f32 1.4214138, %v276_v31  ;;  %v2049_v31 = vmov 38  }
 0x107   : > { %v279_v34 = vmul.f32 %v2011_v20, %v277_v32  ;;  %v2050_v32 = vmov 41  }
 0x108   : > { %v280_v35 = vmul.f32 %v2013_v22, %v278_v33  ;;  %v2051_v33 = vmov 42  }
 0x109   : > { %v281_v36 = vadd.f32 -0.28449672, %v279_v34  ;;  %v2052_v34 = vmov 68  }
 0x10a   : > { %v282_v37 = vadd.f32 -0.28449672, %v280_v35  ;;  %v2053_v35 = vmov 69  }
 0x10b   : > { %v283_v38 = vmul.f32 %v2011_v20, %v281_v36  ;;  %v2054_v36 = vmov 54  }
 0x10c   : > { %v284_v39 = vmul.f32 %v2013_v22, %v282_v37  ;;  %v2055_v37 = vmov 71  }
 0x10d   : > { %v285_v40 = vadd.f32 0.2548296, %v283_v38  ;;  %v2056_v38 = vmov 72  }
 0x10e   : > { %v286_v41 = vadd.f32 0.2548296, %v284_v39  ;;  %v2057_v39 = vmov 56  }
 0x10f   : > { %v287_v42 = vmul.f32 %v2011_v20, %v285_v40  ;;  %v2046_v20 = vmov 67   ;;  %v2058_v40 = vmov 43  }
 0x110   : > { %v288_v44 = vmul.f32 %v2013_v22, %v286_v41  ;;  %v2059_v41 = vmov 44  }
 0x111   : > { %v297_v46 = vmul.f32 %v2015_v43, %v287_v42  ;;  %v2060_v42 = vmov 74   ;;  %v2061_v43 = vmov 45  }
 0x112   : > { %v298_v47 = vmul.f32 %v2017_v45, %v288_v44  ;;  %v2062_v44 = vmov 75   ;;  %v2063_v45 = vmov 46  }
 0x113   : > { %v299_v48 = vsub.f32 1.0, %v297_v46  ;;  %v2064_v46 = vmov 32  }
 0x114   : > { %v300_v49 = vsub.f32 1.0, %v298_v47  ;;  %v2065_v47 = vmov 30  }
 0x115   : > { %v303_v50 = vsub.f32 0.0, %v299_v48 }
 0x116   : > { %v304_v51 = vsub.f32 0.0, %v300_v49 }
 0x117   : > { %v305_v52 = vsel %vm301_vm1, %v299_v48, %v303_v50 }
 0x118   : > { %v306_v54 = vsel %vm302_vm2, %v300_v49, %v304_v51  ;;  %v307_v55 = vadd.f32 1.0, %v305_v52 }
 0x119   : > { %v308_v57 = vadd.f32 1.0, %v306_v54  ;;  %v2067_v54 = vmov 53  }
 0x11a   : > { %v2167_v58 = vmul.f32 %v307_v55, %v257_v53  ;;  %v2066_v53 = vmov 70   ;;  %v2068_v55 = vmov 55  }
 0x11b   : > { %v2169_v59 = vmul.f32 %v308_v57, %v258_v56  ;;  %v2069_v56 = vmov 73   ;;  %v2070_v57 = vmov 57  }
 0x11d   : > { %v315_v60 = vmax.f32 %v2167_v58, %v2169_v59  ;;  %v311_v61 = vadd.f32 %v2169_v59, %v2167_v58 }
 0x11f   : > { %316 = vmax.xlane.f32.xlu1 %v315_v60  ;;  %312 = vadd.xlane.f32.xlu0 %v311_v61  ;;  %v2071_v60 = vmov 58   ;;  %v2072_v61 = vmov 59  }
 0x130   : > { %324 = vrot.lane.b32.xlu1 %v2148_v1, %s2035_s21 }
 0x134   : > { %321 = vperm.xlu1 %1949, %v2148_v1  }
 0x135   : > { %699 = vperm.xlu0 %1956, %v2148_v1  }
 0x138   : > { %403 = vrot.lane.b32.xlu1 %v2148_v1, %s2037_s22 }
 0x139   : > { %1950 = vset.pattern.permute.xlu1 %v2038_v7  ;;  %1957 = vset.pattern.permute.xlu0 %v2044_v19  ;;  %v2084_v19 = vmov 77  }
 0x13a   : > { %736 = vperm.xlu0 %1957, %v2148_v1  }
 0x13c   : > { %400 = vperm.xlu1 %1950, %v2148_v1  }
 0x140   : > { %1951 = vset.pattern.permute.xlu1 %v2039_v14  ;;  %v2081_v14 = vmov 60  }
 0x141   : > { %547 = vperm.xlu1 %1951, %v2148_v1  }
 0x145   : > { %1952 = vset.pattern.permute.xlu1 %v2040_v15 }
 0x146   : > { %580 = vperm.xlu1 %1952, %v2148_v1  }
 0x14a   : > { %1953 = vset.pattern.permute.xlu1 %v2041_v16  ;;  %v2082_v16 = vmov 48  }
 0x14b   : > { %621 = vperm.xlu1 %1953, %v2148_v1  }
 0x14f   : > { %1954 = vset.pattern.permute.xlu1 %v2043_v18  ;;  %v2083_v18 = vmov 79  }
 0x1ac   : > { %v317_v63 = vpop.xlane.xlu1 %316  ;;  %v313_v2 = vpop.xlane.xlu0 %312 }
 0x1ad   : > { %v314_v3 = vmul.f32 0.00390625, %v313_v2 }
 0x1af   : > { %v319_v4 = vsel %vm318_vm4, %v314_v3, %v317_v63  ;;  %v2074_v63 = vmov 76  }
 0x1b0   : > { %v325_v6 = vpop.permute.xlu1 %324  ;;  %1847 = vmatpush3.msra.mxu1 %v319_v4 }
 0x1b1   : > { %1849 = vmatmul.mubr.msk.f32.vlgmr.msra.gmra.mrb[0].mxu1 %vm3265_vm0, %v325_v6 }
 0x1b2   : > { %1686 = vmatprep.mubr.f32.mxu1 %v2032_v0 }
 0x1b4   : > { %v322_v8 = vpop.permute.xlu1 %321  ;;  %v2227_v2 = vpop.permute.xlu0 %699 }
 0x1b8   : > { %v404_v13 = vpop.permute.xlu1 %403 }
 0x1b9   : > { %v2229_v3 = vpop.permute.xlu0 %736 }
 0x1bc   : > { %v401_v21 = vpop.permute.xlu1 %400 }
 0x1c0   : > { %v2213_v48 = vpop.permute.xlu1 %547 }
 0x1c5   : > { %v2215_v49 = vpop.permute.xlu1 %580 }
 0x1ca   : > { %v2217_v50 = vpop.permute.xlu1 %621 }
 0x284   : > { %v394_v9 = vpop.f32.mrb[0].mxu1 }
 0x285   : > { %v395_v10 = vadd.f32 %v394_v9, %v322_v8  ;;  %v1850_v11 = vpop.f32.mrb[1].mxu1 }
 0x287   : > { %v398_v12 = vmax.f32 %v395_v10, 0.0 }
 0x289   : > { %1852 = vmatpush3.msra.mxu0 %v398_v12  ;;  %v2080_v12 = vmov 28  }
 0x28a   : > { %1854 = vmatmul.mubr.msk.f32.vlgmr.msra.gmra.mrb[2].mxu0 %vm3265_vm0, %v404_v13 }
 0x28b   : > { %1759 = vmatprep.mubr.f32.mxu0 %v2032_v0  ;;  %v2045_v0 = vmov 27  }
 0x28c   : > { %1960 = vset.pattern.permute.xlu0 %v2045_v0  ;;  %v2085_v0 = vmov 50  }
 0x28d   : > { %816 = vperm.xlu0 %1960, %v2148_v1  }
 0x291   : > { %1961 = vset.pattern.permute.xlu0 %v2046_v20 }
 0x292   : > { %1374 = vperm.xlu0 %1961, %v2148_v1  }
 0x296   : > { %1964 = vset.pattern.permute.xlu0 %v3249_v29 }
 0x30c   : > { %v2231_v4 = vpop.permute.xlu0 %816 }
 0x311   : > { %v2233_v6 = vpop.permute.xlu0 %1374 }
 0x312   : > { %3289 = vst [vmem:[#allocation3_spill] sm:$0xff] %v2233_v6 }
 0x35d   : > { %v473_v22 = vpop.f32.mrb[2].mxu0 }
 0x35e   : > { %v474_v23 = vadd.f32 %v473_v22, %v401_v21  ;;  %v1855_v24 = vpop.f32.mrb[3].mxu0  ;;  %v2086_v21 = vmov 61   ;;  %v2087_v22 = vmov 51  }
 0x360   : > { %v477_v25 = vsub.f32 0.0, %v474_v23  ;;  %v2088_v23 = vmov 78  }
 0x362   : > { %v478_v26 = vmul.f32 1.442695, %v477_v25  ;;  %v2089_v25 = vmov 52  }
 0x364   : > { %2018 = vpow2.f32 %v478_v26 }
 0x36e   : > { %v2019_v27 = vpop.eup %2018 }
 0x36f   : > { %v480_v28 = vadd.f32 1.0, %v2019_v27  ;;  %v2090_v27 = vmov 49  }
 0x371   : > { %2020 = vrcp.f32 %v480_v28 }
 0x37b   : > { %v2021_v30 = vpop.eup %2020 }
 0x37c   : > { %484 = vrot.lane.b32.xlu1 %v2021_v30, %s2048_s23 }
 0x380   : > { %656 = vperm.xlu1 %1954, %v2148_v1  }
 0x384   : > { %1955 = vset.pattern.permute.xlu1 %v2049_v31  ;;  %v2092_v31 = vmov 62  }
 0x385   : > { %664 = vperm.xlu1 %1955, %v2148_v1  }
 0x389   : > { %1958 = vset.pattern.permute.xlu1 %v2050_v32 }
 0x38a   : > { %771 = vperm.xlu1 %1958, %v2148_v1  }
 0x38e   : > { %1959 = vset.pattern.permute.xlu1 %v2051_v33  ;;  %v2093_v33 = vmov 63  }
 0x38f   : > { %808 = vperm.xlu1 %1959, %v2148_v1  }
 0x393   : > { %1962 = vset.pattern.permute.xlu1 %v2052_v34 }
 0x394   : > { %1380 = vperm.xlu1 %1962, %v2148_v1  }
 0x398   : > { %1963 = vset.pattern.permute.xlu1 %v2053_v35  ;;  %v2094_v35 = vmov 80  }
 0x399   : > { %1388 = vperm.xlu1 %1963, %v2148_v1  }
 0x39d   : > { %1967 = vset.pattern.permute.xlu1 %v2054_v36 }
 0x39e   : > { %1172 = vperm.xlu1 %1967, %v2148_v1  }
 0x3a2   : > { %1968 = vset.pattern.permute.xlu1 %v2055_v37  ;;  %v2095_v37 = vmov 64  }
 0x3a3   : > { %1404 = vperm.xlu1 %1968, %v2148_v1  }
 0x3a7   : > { %1970 = vset.pattern.permute.xlu1 %v2056_v38  ;;  %v2096_v38 = vmov 81  }
 0x3a8   : > { %1412 = vperm.xlu1 %1970, %v2148_v1  }
 0x3ac   : > { %1971 = vset.pattern.permute.xlu1 %v2057_v39 }
 0x3ad   : > { %1188 = vperm.xlu1 %1971, %v2148_v1  }
 0x3b1   : > { %1973 = vset.pattern.permute.xlu1 %v2058_v40  ;;  %v2097_v40 = vmov 65  }
 0x3b2   : > { %1006 = vperm.xlu1 %1973, %v2148_v1  }
 0x3b6   : > { %1974 = vset.pattern.permute.xlu1 %v2059_v41 }
 0x3b7   : > { %1012 = vperm.xlu1 %1974, %v2148_v1  }
 0x3bb   : > { %1976 = vset.pattern.permute.xlu1 %v2060_v42  ;;  %v2098_v42 = vmov 82  }
 0x3bc   : > { %1428 = vperm.xlu1 %1976, %v2148_v1  }
 0x3c0   : > { %1977 = vset.pattern.permute.xlu1 %v2061_v43 }
 0x3c1   : > { %1020 = vperm.xlu1 %1977, %v2148_v1  }
 0x3c5   : > { %1979 = vset.pattern.permute.xlu1 %v2062_v44 }
 0x3c6   : > { %1436 = vperm.xlu1 %1979, %v2148_v1  }
 0x3ca   : > { %1980 = vset.pattern.permute.xlu1 %v2063_v45 }
 0x3cb   : > { %1028 = vperm.xlu1 %1980, %v2148_v1  }
 0x3cf   : > { %1983 = vset.pattern.permute.xlu1 %v2064_v46 }
 0x3d0   : > { %1444 = vperm.xlu1 %1983, %v2148_v1  }
 0x3d4   : > { %1984 = vset.pattern.permute.xlu1 %v2065_v47 }
 0x3d5   : > { %1220 = vperm.xlu1 %1984, %v2148_v1  }
 0x3d9   : > { %1986 = vset.pattern.permute.xlu1 %v2074_v63 }
 0x3ee   : > { %v485_v51 = vpop.permute.xlu1 %484 }
 0x3ef   : > { %v487_v52 = vadd.f32 %v2021_v30, %v485_v51 }
 0x3f1   : > { %490 = vperm.xlu0 %1964, %v487_v52  }
 0x3f5   : > { %1965 = vset.pattern.permute.xlu0 %v2066_v53 }
 0x3f6   : > { %1396 = vperm.xlu0 %1965, %v2148_v1  }
 0x3fa   : > { %1966 = vset.pattern.permute.xlu0 %v2067_v54 }
 0x3fb   : > { %1166 = vperm.xlu0 %1966, %v2148_v1  }
 0x3ff   : > { %1969 = vset.pattern.permute.xlu0 %v2068_v55  ;;  %v2246_v10 = vpop.permute.xlu1 %656 }
 0x400   : > { %1180 = vperm.xlu0 %1969, %v2148_v1  }
 0x404   : > { %1972 = vset.pattern.permute.xlu0 %v2069_v56 }
 0x405   : > { %1420 = vperm.xlu0 %1972, %v2148_v1  }
 0x409   : > { %1975 = vset.pattern.permute.xlu0 %v2070_v57 }
 0x40a   : > { %1196 = vperm.xlu0 %1975, %v2148_v1  }
 0x40e   : > { %1978 = vset.pattern.permute.xlu0 %v2071_v60 }
 0x40f   : > { %1204 = vperm.xlu0 %1978, %v2148_v1  }
 0x413   : > { %1981 = vset.pattern.permute.xlu0 %v2072_v61 }
 0x414   : > { %1212 = vperm.xlu0 %1981, %v2148_v1  }
 0x418   : > { %1982 = vset.pattern.permute.xlu0 %v2073_v62 }
 0x419   : > { %1036 = vperm.xlu0 %1982, %v2148_v1  }
 0x41d   : > { %1985 = vset.pattern.permute.xlu0 %v2080_v12  ;;  %v515_v12 = vlaneseq }
 0x470   : > { %v491_v7 = vpop.permute.xlu0 %490 }
 0x471   : > { %v2236_v8 = vmul.f32 %v491_v7, %v2167_v58  ;;  %v2239_v9 = vmul.f32 %v491_v7, %v2169_v59  ;;  %v2254_v58 = vpop.permute.xlu1 %664 }
 0x473   : > { %3290 = vst [vmem:[#allocation4_spill] sm:$0xff] %v2236_v8  ;;  %3291 = vst [vmem:[#allocation5_spill] sm:$0xff] %v2239_v9  ;;  %673 = vrot.lane.b32.xlu0 %v2239_v9, %s2048_s23  ;;  %511 = vrot.lane.b32.xlu1 %v2236_v8, %s2075_s24 }
 0x475   : > { %v2257_v59 = vpop.permute.xlu1 %771  ;;  %v2326_v47 = vpop.permute.xlu0 %1396 }
 0x476   : > { %3299 = vst [vmem:[#allocation13_spill] sm:$0xff] %v2326_v47 }
 0x477   : > { %706 = vrot.lane.b32.xlu0 %v2236_v8, %s2076_s25  ;;  %513 = vrot.lane.b32.xlu1 %v2239_v9, %s2075_s24 }
 0x479   : > { %v2262_v11 = vpop.permute.xlu1 %808 }
 0x47a   : > { %v2330_v52 = vpop.permute.xlu0 %1166 }
 0x47b   : > { %743 = vrot.lane.b32.xlu0 %v2236_v8, %s2037_s22  ;;  %552 = vrot.lane.b32.xlu1 %v2236_v8, %s2077_s26 }
 0x47d   : > { %v2267_v13 = vpop.permute.xlu1 %1380 }
 0x47f   : > { %554 = vrot.lane.b32.xlu1 %v2239_v9, %s2077_s26  ;;  %1044 = vperm.xlu0 %1985, %v2148_v1   ;;  %v2339_v54 = vpop.permute.xlu0 %1180 }
 0x481   : > { %v2273_v15 = vpop.permute.xlu1 %1388 }
 0x482   : > { %3292 = vst [vmem:[#allocation6_spill] sm:$0xff] %v2273_v15 }
 0x483   : > { %587 = vrot.lane.b32.xlu1 %v2236_v8, %s2078_s27  ;;  %1988 = vset.pattern.permute.xlu0 %v2081_v14 }
 0x484   : > { %1253 = vperm.xlu0 %1988, %v2148_v1   ;;  %v2347_v60 = vpop.permute.xlu0 %1420 }
 0x485   : > { %v2277_v17 = vpop.permute.xlu1 %1172  ;;  %3300 = vst [vmem:[#allocation14_spill] sm:$0xff] %v2347_v60 }
 0x487   : > { %589 = vrot.lane.b32.xlu1 %v2239_v9, %s2078_s27 }
 0x488   : > { %1991 = vset.pattern.permute.xlu0 %v2082_v16 }
 0x489   : > { %1077 = vperm.xlu0 %1991, %v2148_v1   ;;  %v2281_v20 = vpop.permute.xlu1 %1404  ;;  %v2359_v14 = vpop.permute.xlu0 %1196 }
 0x48a   : > { %3293 = vst [vmem:[#allocation7_spill] sm:$0xff] %v2281_v20 }
 0x48b   : > { %628 = vrot.lane.b32.xlu1 %v2236_v8, %s2079_s28 }
 0x48d   : > { %1994 = vset.pattern.permute.xlu0 %v2083_v18  ;;  %v2286_v24 = vpop.permute.xlu1 %1412 }
 0x48e   : > { %1523 = vperm.xlu0 %1994, %v2148_v1   ;;  %3294 = vst [vmem:[#allocation8_spill] sm:$0xff] %v2286_v24 }
 0x48f   : > { %630 = vrot.lane.b32.xlu1 %v2239_v9, %s2079_s28 }
 0x491   : > { %v2292_v26 = vpop.permute.xlu1 %1188 }
 0x492   : > { %1995 = vset.pattern.permute.xlu0 %v2085_v0  ;;  %v527_v0 = vshrl.u32 %v515_v12, 7 }
 0x493   : > { %671 = vrot.lane.b32.xlu1 %v2236_v8, %s2048_s23  ;;  %1099 = vperm.xlu0 %1995, %v2148_v1  }
 0x495   : > { %v2295_v28 = vpop.permute.xlu1 %1006 }
 0x497   : > { %708 = vrot.lane.b32.xlu1 %v2239_v9, %s2076_s25  ;;  %1998 = vset.pattern.permute.xlu0 %v2087_v22  ;;  %v2375_v22 = vpop.permute.xlu0 %1204  ;;  %s172_s25 = scalar_lea.vmem %s3244_s3, %s1830_s17 }
 0x498   : > { %1115 = vperm.xlu0 %1998, %v2148_v1  }
 0x499   : > { %v2299_v30 = vpop.permute.xlu1 %1012 }
 0x49b   : > { %1477 = vperm.xlu1 %1986, %v2148_v1  }
 0x49c   : > { %2001 = vset.pattern.permute.xlu0 %v2089_v25 }
 0x49d   : > { %1150 = vperm.xlu0 %2001, %v2148_v1   ;;  %v2302_v32 = vpop.permute.xlu1 %1428 }
 0x49e   : > { %3295 = vst [vmem:[#allocation9_spill] sm:$0xff] %v2302_v32 }
 0x49f   : > { %1987 = vset.pattern.permute.xlu1 %v2084_v19 }
 0x4a0   : > { %1491 = vperm.xlu1 %1987, %v2148_v1  }
 0x4a1   : > { %v2305_v34 = vpop.permute.xlu1 %1020 }
 0x4a4   : > { %1989 = vset.pattern.permute.xlu1 %v2086_v21 }
 0x4a5   : > { %1267 = vperm.xlu1 %1989, %v2148_v1   ;;  %v2308_v36 = vpop.permute.xlu1 %1436 }
 0x4a6   : > { %3296 = vst [vmem:[#allocation10_spill] sm:$0xff] %v2308_v36  ;;  %v2402_v36 = vand.u32 127, %v515_v12 }
 0x4a8   : > { %vm556_vm11 = vcmp.lt.s32.totalorder %v2402_v36, 16  ;;  %vm517_vm12 = vcmp.lt.s32.totalorder %v2402_v36, 17  ;;  %vm591_vm1 = vcmp.lt.s32.totalorder %v2402_v36, 15 }
 0x4a9   : > { %1990 = vset.pattern.permute.xlu1 %v2088_v23  ;;  %v2311_v39 = vpop.permute.xlu1 %1028  ;;  %v2377_v23 = vsub.s32 0, %v527_v0 }
 0x4aa   : > { %1507 = vperm.xlu1 %1990, %v2148_v1  }
 0x4ad   : > { %v2315_v41 = vpop.permute.xlu1 %1444 }
 0x4ae   : > { %745 = vrot.lane.b32.xlu1 %v2239_v9, %s2037_s22  ;;  %3297 = vst [vmem:[#allocation11_spill] sm:$0xff] %v2315_v41 }
 0x4af   : > { %1992 = vset.pattern.permute.xlu1 %v2090_v27 }
 0x4b1   : > { %v2318_v43 = vpop.permute.xlu1 %1220 }
 0x4b2   : > { %778 = vrot.lane.b32.xlu1 %v2236_v8, %s2091_s29  ;;  %3298 = vst [vmem:[#allocation12_spill] sm:$0xff] %v2318_v43 }
 0x4b6   : > { %780 = vrot.lane.b32.xlu1 %v2239_v9, %s2091_s29 }
 0x4ba   : > { %1091 = vperm.xlu1 %1992, %v2148_v1  }
 0x4be   : > { %1993 = vset.pattern.permute.xlu1 %v2092_v31  ;;  %v2382_v31 = vsub.s32 2, %v527_v0 }
 0x4bf   : > { %1283 = vperm.xlu1 %1993, %v2148_v1  }
 0x4c3   : > { %1996 = vset.pattern.permute.xlu1 %v2093_v33 }
 0x4c4   : > { %1291 = vperm.xlu1 %1996, %v2148_v1  }
 0x4c8   : > { %1997 = vset.pattern.permute.xlu1 %v2094_v35 }
 0x4c9   : > { %1531 = vperm.xlu1 %1997, %v2148_v1  }
 0x4cd   : > { %1999 = vset.pattern.permute.xlu1 %v2095_v37  ;;  %v2389_v37 = vsub.s32 1, %v527_v0 }
 0x4ce   : > { %1307 = vperm.xlu1 %1999, %v2148_v1  }
 0x4d2   : > { %2000 = vset.pattern.permute.xlu1 %v2096_v38  ;;  %v2391_v38 = vpop.permute.xlu0 %1212 }
 0x4d3   : > { %1547 = vperm.xlu1 %2000, %v2148_v1  }
 0x4d6   : > { %v2416_v43 = vpop.permute.xlu0 %1036 }
 0x4d7   : > { %2002 = vset.pattern.permute.xlu1 %v2097_v40 }
 0x4d8   : > { %1323 = vperm.xlu1 %2002, %v2148_v1  }
 0x4dc   : > { %2003 = vset.pattern.permute.xlu1 %v2098_v42 }
 0x4dd   : > { %1563 = vperm.xlu1 %2003, %v2148_v1   ;;  %v2337_v1 = vld [vmem:[%s3243_s2] sm:$0xf] }
 0x4de   : > { %v501_v55 = vadd.s32 4294967295, %v2337_v1  ;;  %v2345_v57 = vadd.s32 1, %v2337_v1 }
 0x4e0   : > { %vm502_vm5 = vcmp.ge.s32.totalorder %v501_v55, 0  ;;  %vm504_vm6 = vcmp.lt.s32.totalorder %v2345_v57, 16 }
 0x4e1   : > { %v520_v61 = vsel %vm502_vm5, 1, %v3249_v29  ;;  %v2357_v7 = vsel %vm504_vm6, 1, %v3249_v29 }
 0x4e2   : > { %v1836_v63 = vrot.slane %v520_v61, 9  ;;  %v1837_v16 = vrot.slane %v2357_v7, 9  ;;  %v562_v42 = vrot.slane %v520_v61, %v2377_v23  ;;  %v638_v32 = vrot.slane %v520_v61, %v2389_v37 }
 0x4e4   : > { %vm2364_vm7 = vcmp.ne.s32.totalorder %v1836_v63, 0  ;;  %vm2371_vm9 = vcmp.ne.s32.totalorder %v1837_v16, 0  ;;  %v566_v63 = vrot.slane %v520_v61, %v2382_v31  ;;  %v2396_v16 = vsub.s32 3, %v527_v0 }
 0x4e5   : > { %v2320_v44 = vpop.permute.xlu1 %511  ;;  %vm524_vm8 = vmand %vm502_vm5, %vm2364_vm7  ;;  %v2408_v60 = vrot.slane %v562_v42, %v2377_v23 }
 0x4e6   : > { %v525_v27 = vsel %vm524_vm8, 1, %v3249_v29  ;;  %vm598_vm10 = vmand %vm502_vm5, %vm2371_vm9  ;;  %v2411_v0 = vrot.slane %v566_v63, %v2377_v23  ;;  %v642_v24 = vrot.slane %v520_v61, %v2396_v16  ;;  %v681_v61 = vrot.slane %v2357_v7, %v2389_v37 }
 0x4e7   : > { %v529_v33 = vrot.slane %v525_v27, %v2377_v23  ;;  %v599_v35 = vsel %vm598_vm10, 1, %v3249_v29  ;;  %v533_v40 = vrot.slane %v525_v27, %v2382_v31  ;;  %3305 = vst [vmem:[#allocation15_spill] sm:$0xff] %v2408_v60  ;;  %vm575_vm15 = vcmp.eq.s32.totalorder %v2408_v60, 1  ;;  %vm713_vm2 = vmand %vm504_vm6, %vm2364_vm7 }
 0x4e8   : > { %v603_v55 = vrot.slane %v599_v35, %v2377_v23  ;;  %v607_v41 = vrot.slane %v599_v35, %v2382_v31  ;;  %3306 = vst [vmem:[#allocation16_spill] sm:$0xff] %v2411_v0  ;;  %v2423_v35 = vrot.slane %v638_v32, %v2389_v37  ;;  %vm576_vm3 = vcmp.eq.s32.totalorder %v2411_v0, 1 }
 0x4e9   : > { %v2322_v45 = vpop.permute.xlu1 %513  ;;  %v537_v29 = vrot.slane %v529_v33, %v2377_v23  ;;  %v541_v27 = vrot.slane %v533_v40, %v2377_v23  ;;  %v685_v40 = vrot.slane %v2357_v7, %v2396_v16  ;;  %vm632_vm7 = vcmp.lt.s32.totalorder %v2402_v36, 1 }
 0x4ea   : > { %v611_v12 = vrot.slane %v603_v55, %v2377_v23  ;;  %v615_v33 = vrot.slane %v607_v41, %v2377_v23  ;;  %v2439_v41 = vrot.slane %v642_v24, %v2389_v37  ;;  %v519_v24 = vsel %vm517_vm12, %v2322_v45, %v2320_v44 }
 0x4eb   : > { %vm542_vm13 = vcmp.eq.s32.totalorder %v537_v29, 1  ;;  %vm543_vm14 = vcmp.eq.s32.totalorder %v541_v27, 1  ;;  %vm651_vm8 = vcmp.eq.s32.totalorder %v2423_v35, 1  ;;  %v3309_v55 = vmov 0  }
 0x4ec   : > { %vm616_vm4 = vcmp.eq.s32.totalorder %v611_v12, 1  ;;  %vm617_vm5 = vcmp.eq.s32.totalorder %v615_v33, 1  ;;  %v2471_v15 = vrot.slane %v681_v61, %v2389_v37  ;;  %vm652_vm10 = vcmp.eq.s32.totalorder %v2439_v41, 1 }
 0x4ed   : > { %v2324_v46 = vpop.permute.xlu1 %552 }
 0x4f1   : > { %v2328_v51 = vpop.permute.xlu1 %554 }
 0x4f2   : > { %v558_v32 = vsel %vm556_vm11, %v2328_v51, %v2324_v46  ;;  %v557_v19 = vsel %vm556_vm11, %v2324_v46, %v2328_v51  ;;  %v714_v46 = vsel %vm713_vm2, 1, %v3309_v55  ;;  %v674_v51 = vpop.permute.xlu0 %673 }
 0x4f3   : > { %v578_v6 = vsel %vm576_vm3, %v557_v19, 0.0  ;;  %v718_v61 = vrot.slane %v714_v46, %v2377_v23 }
 0x4f4   : > { %v584_v29 = vmul.f32 %v2215_v49, %v578_v6 }
 0x4f5   : > { %v2332_v53 = vpop.permute.xlu1 %587  ;;  %v726_v57 = vrot.slane %v718_v61, %v2377_v23 }
 0x4f6   : > { %v707_v27 = vpop.permute.xlu0 %706 }
 0x4f7   : > { %vm731_vm2 = vcmp.eq.s32.totalorder %v726_v57, 1 }
 0x4f9   : > { %v2342_v56 = vpop.permute.xlu1 %589 }
 0x4fa   : > { %v593_v63 = vsel %vm591_vm1, %v2342_v56, %v2332_v53  ;;  %v592_v47 = vsel %vm591_vm1, %v2332_v53, %v2342_v56 }
 0x4fb   : > { %v618_v53 = vsel %vm616_vm4, %v593_v63, 0.0  ;;  %v619_v60 = vsel %vm617_vm5, %v592_v47, 0.0 }
 0x4fc   : > { %v624_v47 = vmul.f32 %v2217_v50, %v618_v53  ;;  %v625_v33 = vmul.f32 %v2217_v50, %v619_v60 }
 0x4fd   : > { %v2352_v62 = vpop.permute.xlu1 %628 }
 0x501   : > { %v2362_v18 = vpop.permute.xlu1 %630 }
 0x502   : > { %v633_v56 = vsel %vm632_vm7, %v2352_v62, %v2362_v18 }
 0x505   : > { %v2379_v25 = vpop.permute.xlu1 %671 }
 0x509   : > { %v2398_v5 = vpop.permute.xlu1 %708 }
 0x51a   : > { %v2414_v20 = vpop.permute.xlu1 %1477 }
 0x51b   : > { %3307 = vst [vmem:[#allocation17_spill] sm:$0xff] %v2414_v20  ;;  %v518_v20 = vsel %vm517_vm12, %v2320_v44, %v2322_v45  ;;  %v634_v44 = vsel %vm632_vm7, %v2362_v18, %v2352_v62  ;;  %v2481_v45 = vrot.slane %v685_v40, %v2389_v37  ;;  %vm675_vm12 = vcmp.lt.s32.totalorder %v2402_v36, 127 }
 0x51c   : > { %v545_v19 = vsel %vm543_vm14, %v518_v20, 0.0  ;;  %v653_v12 = vsel %vm651_vm8, %v634_v44, 0.0  ;;  %v722_v62 = vrot.slane %v714_v46, %v2382_v31  ;;  %vm785_vm14 = vmand %vm504_vm6, %vm2371_vm9  ;;  %v654_v18 = vsel %vm652_vm10, %v633_v56, 0.0 }
 0x51d   : > { %v551_v6 = vmul.f32 %v2213_v48, %v545_v19  ;;  %vm695_vm1 = vcmp.eq.s32.totalorder %v2481_v45, 1  ;;  %v786_v63 = vsel %vm785_vm14, 1, %v3309_v55  ;;  %v660_v44 = vmul.f32 %v2246_v10, %v654_v18 }
 0x51e   : > { %vm710_vm6 = vcmp.lt.s32.totalorder %v2402_v36, 113  ;;  %vm747_vm9 = vcmp.lt.s32.totalorder %v2402_v36, 112  ;;  %v790_v53 = vrot.slane %v786_v63, %v2377_v23  ;;  %v794_v56 = vrot.slane %v786_v63, %v2382_v31 }
 0x51f   : > { %v2448_v42 = vpop.permute.xlu1 %1491  ;;  %v586_v46 = vadd.f32 %v584_v29, %v551_v6  ;;  %v711_v19 = vsel %vm710_vm6, %v707_v27, %v2398_v5  ;;  %v712_v18 = vsel %vm710_vm6, %v2398_v5, %v707_v27  ;;  %v668_v6 = vmul.f32 %v2254_v58, %v2239_v9 }
 0x520   : > { %3308 = vst [vmem:[#allocation18_spill] sm:$0xff] %v2448_v42  ;;  %v577_v42 = vsel %vm575_vm15, %v558_v32, 0.0  ;;  %v544_v32 = vsel %vm542_vm13, %v519_v24, 0.0  ;;  %vm694_vm13 = vcmp.eq.s32.totalorder %v2471_v15, 1  ;;  %v757_v24 = vrot.slane %v2357_v7, %v2382_v31 }
 0x521   : > { %v583_v0 = vmul.f32 %v2215_v49, %v577_v42  ;;  %v550_v20 = vmul.f32 %v2213_v48, %v544_v32  ;;  %v753_v49 = vrot.slane %v2357_v7, %v2377_v23  ;;  %v659_v42 = vmul.f32 %v2246_v10, %v653_v12 }
 0x522   : > { %v730_v48 = vrot.slane %v722_v62, %v2377_v23  ;;  %v627_v32 = vadd.f32 %v625_v33, %v586_v46  ;;  %v677_v10 = vsel %vm675_vm12, %v674_v51, %v2379_v25  ;;  %v2540_v29 = vrot.slane %v757_v24, %v2377_v23  ;;  %v744_v62 = vpop.permute.xlu0 %743 }
 0x523   : > { %v585_v21 = vadd.f32 %v583_v0, %v550_v20  ;;  %v676_v0 = vsel %vm675_vm12, %v2379_v25, %v674_v51  ;;  %v2529_v7 = vrot.slane %v753_v49, %v2377_v23  ;;  %v667_v12 = vmul.f32 %v2254_v58, %v2236_v8 }
 0x524   : > { %v2494_v40 = vpop.permute.xlu1 %1267  ;;  %v662_v20 = vadd.f32 %v660_v44, %v627_v32  ;;  %v696_v25 = vsel %vm694_vm13, %v676_v0, 0.0  ;;  %vm732_vm4 = vcmp.eq.s32.totalorder %v730_v48, 1  ;;  %v733_v33 = vsel %vm731_vm2, %v711_v19, 0.0 }
 0x525   : > { %3310 = vst [vmem:[#allocation19_spill] sm:$0xff] %v2494_v40  ;;  %v626_v60 = vadd.f32 %v624_v47, %v585_v21  ;;  %v697_v47 = vsel %vm695_vm1, %v677_v10, 0.0  ;;  %vm3271_vm5 = vcmp.eq.s32.totalorder %v2529_v7, 1  ;;  %v798_v57 = vrot.slane %v790_v53, %v2377_v23 }
 0x526   : > { %v802_v21 = vrot.slane %v794_v56, %v2377_v23  ;;  %v702_v24 = vmul.f32 %v2227_v2, %v696_v25  ;;  %vm3270_vm14 = vcmp.eq.s32.totalorder %v2540_v29, 1  ;;  %v670_v27 = vadd.f32 %v668_v6, %v662_v20 }
 0x527   : > { %v661_v61 = vadd.f32 %v659_v42, %v626_v60  ;;  %v703_v63 = vmul.f32 %v2227_v2, %v697_v47  ;;  %v734_v46 = vsel %vm732_vm4, %v712_v18, 0.0  ;;  %v739_v60 = vmul.f32 %v2229_v3, %v733_v33 }
 0x528   : > { %vm782_vm6 = vcmp.lt.s32.totalorder %v2402_v36, 111  ;;  %vm803_vm2 = vcmp.eq.s32.totalorder %v798_v57, 1  ;;  %vm804_vm0 = vcmp.eq.s32.totalorder %v802_v21, 1  ;;  %v740_v10 = vmul.f32 %v2229_v3, %v734_v46 }
 0x529   : > { %v2522_v50 = vpop.permute.xlu1 %1507  ;;  %v669_v42 = vadd.f32 %v667_v12, %v661_v61  ;;  %v705_v48 = vadd.f32 %v703_v63, %v670_v27  ;;  %v2099_v56 = vmov 66   ;;  %v2100_v33 = vmov 83   ;;  %v2615_v63 = vpop.permute.xlu0 %1044 }
 0x52a   : > { %3311 = vst [vmem:[#allocation20_spill] sm:$0xff] %v2522_v50  ;;  %2004 = vset.pattern.permute.xlu0 %v2099_v56  ;;  %2005 = vset.pattern.permute.xlu1 %v2100_v33 }
 0x52b   : > { %v704_v32 = vadd.f32 %v702_v24, %v669_v42  ;;  %v2108_v42 = vmov 31   ;;  %v2109_v24 = vmov 29  }
 0x52d   : > { %v746_v51 = vpop.permute.xlu1 %745  ;;  %v741_v61 = vadd.f32 %v739_v60, %v704_v32  ;;  %v2110_v32 = vmov 33  }
 0x52e   : > { %v748_v49 = vsel %vm747_vm9, %v744_v62, %v746_v51  ;;  %v749_v5 = vsel %vm747_vm9, %v746_v51, %v744_v62  ;;  %v742_v51 = vadd.f32 %v740_v10, %v705_v48 }
 0x52f   : > { %v768_v58 = vsel %vm3271_vm5, %v748_v49, 0.0  ;;  %v769_v0 = vsel %vm3270_vm14, %v749_v5, 0.0  ;;  %vm853_vm5 = vcmp.lt.s32.totalorder %v2402_v36, 3 }
 0x530   : > { %v774_v2 = vmul.f32 %v2257_v59, %v768_v58  ;;  %v775_v19 = vmul.f32 %v2257_v59, %v769_v0  ;;  %v2619_v58 = vpop.permute.xlu0 %1253 }
 0x531   : > { %v779_v44 = vpop.permute.xlu1 %778  ;;  %3314 = vst [vmem:[#allocation23_spill] sm:$0xff] %v2619_v58 }
 0x532   : > { %v776_v47 = vadd.f32 %v774_v2, %v741_v61  ;;  %v777_v3 = vadd.f32 %v775_v19, %v742_v51  ;;  %v499_v19 = vadd.s32 4294967294, %v2337_v1 }
 0x534   : > { %v2623_v60 = vpop.permute.xlu0 %1077 }
 0x535   : > { %v781_v53 = vpop.permute.xlu1 %780 }
 0x536   : > { %v783_v12 = vsel %vm782_vm6, %v779_v44, %v781_v53  ;;  %v784_v62 = vsel %vm782_vm6, %v781_v53, %v779_v44  ;;  %vm881_vm6 = vcmp.lt.s32.totalorder %v2402_v36, 2 }
 0x537   : > { %v805_v20 = vsel %vm803_vm2, %v783_v12, 0.0  ;;  %v806_v25 = vsel %vm804_vm0, %v784_v62, 0.0  ;;  %vm500_vm0 = vcmp.ge.s32.totalorder %v499_v19, 0 }
 0x538   : > { %v811_v18 = vmul.f32 %v2262_v11, %v805_v20  ;;  %v812_v49 = vmul.f32 %v2262_v11, %v806_v25  ;;  %v2107_v11 = vmov 84   ;;  %v2627_v10 = vpop.permute.xlu0 %1523  ;;  %v497_v20 = vadd.s32 4294967293, %v2337_v1 }
 0x539   : > { %v2611_v5 = vpop.permute.xlu1 %1091  ;;  %3317 = vst [vmem:[#allocation26_spill] sm:$0xff] %v2627_v10  ;;  %v2646_v25 = vsel %vm500_vm0, 1, %v3309_v55 }
 0x53a   : > { %v813_v6 = vadd.f32 %v811_v18, %v776_v47  ;;  %v814_v57 = vadd.f32 %v812_v49, %v777_v3  ;;  %vm498_vm4 = vcmp.ge.s32.totalorder %v497_v20, 0  ;;  %v888_v18 = vrot.slane %v2646_v25, %v2389_v37 }
 0x53b   : > { %v892_v49 = vrot.slane %v2646_v25, %v2396_v16  ;;  %v505_v3 = vadd.s32 2, %v2337_v1 }
 0x53c   : > { %v2576_v21 = vadd.f32 %v2231_v4, %v813_v6  ;;  %v2581_v59 = vadd.f32 %v2231_v4, %v814_v57  ;;  %v2601_v4 = vld [vmem:[%s3242_s1] sm:$0xff]  ;;  %v2631_v48 = vpop.permute.xlu0 %1099  ;;  %v2658_v6 = vsel %vm498_vm4, 1, %v3309_v55 }
 0x53d   : > { %3323 = vst [vmem:[#allocation32_spill] sm:$0xff] %v2658_v6  ;;  %vm506_vm2 = vcmp.lt.s32.totalorder %v505_v3, 16  ;;  %v864_v19 = vrot.slane %v2658_v6, %v2396_v16 }
 0x53e   : > { %849 = vrot.lane.b32.xlu0 %v2576_v21, %s2101_s5  ;;  %821 = vrot.lane.b32.xlu1 %v2576_v21, %s2102_s6  ;;  %v2613_v27 = vpop.permute.xlu1 %1283 }
 0x53f   : > { %3312 = vst [vmem:[#allocation21_spill] sm:$0xff] %v2613_v27 }
 0x540   : > { %v2635_v56 = vpop.permute.xlu0 %1115 }
 0x541   : > { %3320 = vst [vmem:[#allocation29_spill] sm:$0xff] %v2635_v56 }
 0x542   : > { %877 = vrot.lane.b32.xlu0 %v2576_v21, %s2103_s7  ;;  %823 = vrot.lane.b32.xlu1 %v2581_v59, %s2102_s6 }
 0x543   : > { %v2617_v46 = vpop.permute.xlu1 %1291 }
 0x544   : > { %3313 = vst [vmem:[#allocation22_spill] sm:$0xff] %v2617_v46  ;;  %v2640_v12 = vpop.permute.xlu0 %1150  ;;  %v1024_v46 = vmul.f32 %v2305_v34, %v2581_v59 }
 0x545   : > { %3322 = vst [vmem:[#allocation31_spill] sm:$0xff] %v2640_v12 }
 0x546   : > { %907 = vrot.lane.b32.xlu0 %v2581_v59, %s2079_s28  ;;  %851 = vrot.lane.b32.xlu1 %v2581_v59, %s2101_s5 }
 0x548   : > { %v2621_v44 = vpop.permute.xlu1 %1531 }
 0x549   : > { %3315 = vst [vmem:[#allocation24_spill] sm:$0xff] %v2621_v44 }
 0x54a   : > { %915 = vrot.lane.b32.xlu0 %v2581_v59, %s2048_s23  ;;  %879 = vrot.lane.b32.xlu1 %v2581_v59, %s2103_s7 }
 0x54d   : > { %v2625_v0 = vpop.permute.xlu1 %1307 }
 0x54e   : > { %923 = vrot.lane.b32.xlu0 %v2581_v59, %s2104_s8  ;;  %905 = vrot.lane.b32.xlu1 %v2576_v21, %s2079_s28  ;;  %3316 = vst [vmem:[#allocation25_spill] sm:$0xff] %v2625_v0 }
 0x552   : > { %979 = vrot.lane.b32.xlu0 %v2581_v59, %s2105_s9  ;;  %913 = vrot.lane.b32.xlu1 %v2576_v21, %s2048_s23  ;;  %v2629_v2 = vpop.permute.xlu1 %1547 }
 0x553   : > { %3318 = vst [vmem:[#allocation27_spill] sm:$0xff] %v2629_v2 }
 0x556   : > { %921 = vrot.lane.b32.xlu1 %v2576_v21, %s2104_s8  ;;  %1358 = vperm.xlu0 %2004, %v2601_v4  }
 0x557   : > { %v2633_v53 = vpop.permute.xlu1 %1323 }
 0x558   : > { %3319 = vst [vmem:[#allocation28_spill] sm:$0xff] %v2633_v53 }
 0x55a   : > { %949 = vrot.lane.b32.xlu1 %v2576_v21, %s2106_s13  ;;  %2007 = vset.pattern.permute.xlu0 %v2107_v11  ;;  %v896_v11 = vrot.slane %v888_v18, %v2389_v37  ;;  %v2669_v18 = vsel %vm506_vm2, 1, %v3309_v55 }
 0x55b   : > { %1607 = vperm.xlu0 %2007, %v2601_v4  }
 0x55c   : > { %v2637_v61 = vpop.permute.xlu1 %1563  ;;  %vm901_vm0 = vcmp.eq.s32.totalorder %v896_v11, 1 }
 0x55d   : > { %3321 = vst [vmem:[#allocation30_spill] sm:$0xff] %v2637_v61 }
 0x55e   : > { %951 = vrot.lane.b32.xlu1 %v2581_v59, %s2106_s13 }
 0x55f   : > { %2008 = vset.pattern.permute.xlu0 %v2108_v42  ;;  %v900_v42 = vrot.slane %v892_v49, %v2389_v37  ;;  %v507_v49 = vadd.s32 3, %v2337_v1 }
 0x560   : > { %1366 = vperm.xlu0 %2008, %v2601_v4  }
 0x561   : > { %vm902_vm4 = vcmp.eq.s32.totalorder %v900_v42, 1  ;;  %v932_v42 = vrot.slane %v2669_v18, %v2389_v37 }
 0x562   : > { %977 = vrot.lane.b32.xlu1 %v2576_v21, %s2105_s9 }
 0x564   : > { %2009 = vset.pattern.permute.xlu0 %v2110_v32  ;;  %v495_v32 = vadd.s32 4294967292, %v2337_v1 }
 0x566   : > { %1579 = vperm.xlu1 %2005, %v2601_v4   ;;  %vm496_vm14 = vcmp.ge.s32.totalorder %v495_v32, 0 }
 0x56a   : > { %2006 = vset.pattern.permute.xlu1 %v2109_v24  ;;  %v860_v24 = vrot.slane %v2658_v6, %v2389_v37 }
 0x56b   : > { %1158 = vperm.xlu1 %2006, %v2601_v4  }
 0x56c   : > { %v868_v61 = vrot.slane %v860_v24, %v2389_v37 }
 0x56e   : > { %vm873_vm2 = vcmp.eq.s32.totalorder %v868_v61, 1 }
 0x5b0   : > { %v2642_v62 = vpop.permute.xlu1 %821  ;;  %v2648_v51 = vpop.permute.xlu0 %849 }
 0x5b4   : > { %v2650_v47 = vpop.permute.xlu1 %823  ;;  %v878_v33 = vpop.permute.xlu0 %877 }
 0x5b8   : > { %v852_v57 = vpop.permute.xlu1 %851  ;;  %v908_v2 = vpop.permute.xlu0 %907 }
 0x5b9   : > { %v855_v35 = vsel %vm853_vm5, %v852_v57, %v2648_v51 }
 0x5bc   : > { %v880_v20 = vpop.permute.xlu1 %879 }
 0x5bd   : > { %v882_v8 = vsel %vm881_vm6, %v878_v33, %v880_v20  ;;  %v883_v9 = vsel %vm881_vm6, %v880_v20, %v878_v33  ;;  %v936_v33 = vrot.slane %v2669_v18, %v2396_v16  ;;  %v872_v20 = vrot.slane %v864_v19, %v2389_v37 }
 0x5be   : > { %v2674_v3 = vsel %vm901_vm0, %v883_v9, 0.0  ;;  %v2676_v44 = vsel %vm902_vm4, %v882_v8, 0.0  ;;  %vm508_vm6 = vcmp.lt.s32.totalorder %v507_v49, 16  ;;  %v2688_v9 = vsel %vm496_vm14, 1, %v3309_v55 }
 0x5bf   : > { %v1009_v19 = vmul.f32 %v2295_v28, %v2674_v3  ;;  %v1010_v50 = vmul.f32 %v2295_v28, %v2676_v44  ;;  %v2712_v53 = vsel %vm508_vm6, 1, %v3309_v55  ;;  %v1175_v61 = vmul.f32 %v2277_v17, %v2674_v3 }
 0x5c0   : > { %v906_v11 = vpop.permute.xlu1 %905 }
 0x5c1   : > { %v909_v24 = vsel %vm632_vm7, %v906_v11, %v908_v2  ;;  %v910_v32 = vsel %vm632_vm7, %v908_v2, %v906_v11  ;;  %v916_v11 = vpop.permute.xlu0 %915  ;;  %vm874_vm7 = vcmp.eq.s32.totalorder %v872_v20, 1 }
 0x5c2   : > { %v2692_v8 = vsel %vm651_vm8, %v910_v32, 0.0  ;;  %v2696_v10 = vsel %vm652_vm10, %v909_v24, 0.0  ;;  %v940_v24 = vrot.slane %v932_v42, %v2389_v37  ;;  %v944_v32 = vrot.slane %v936_v33, %v2389_v37 }
 0x5c3   : > { %v1015_v2 = vmul.f32 %v2299_v30, %v2692_v8  ;;  %v1016_v49 = vmul.f32 %v2299_v30, %v2696_v10  ;;  %v1023_v42 = vmul.f32 %v2305_v34, %v2576_v21  ;;  %vm925_vm8 = vcmp.lt.s32.totalorder %v2402_v36, 126 }
 0x5c4   : > { %v914_v41 = vpop.permute.xlu1 %913  ;;  %v2724_v33 = vsel %vm873_vm2, %v855_v35, 0.0  ;;  %v854_v34 = vsel %vm853_vm5, %v2648_v51, %v852_v57  ;;  %vm945_vm10 = vcmp.eq.s32.totalorder %v940_v24, 1  ;;  %v1183_v57 = vmul.f32 %v2339_v54, %v2692_v8 }
 0x5c5   : > { %v1017_v28 = vadd.f32 %v1015_v2, %v1009_v19  ;;  %v1018_v0 = vadd.f32 %v1016_v49, %v1010_v50  ;;  %v917_v30 = vsel %vm675_vm12, %v914_v41, %v916_v11  ;;  %v918_v27 = vsel %vm675_vm12, %v916_v11, %v914_v41  ;;  %v924_v41 = vpop.permute.xlu0 %923 }
 0x5c6   : > { %v2728_v50 = vsel %vm694_vm13, %v917_v30, 0.0  ;;  %v2732_v19 = vsel %vm695_vm1, %v918_v27, 0.0  ;;  %v960_v2 = vrot.slane %v2712_v53, %v2389_v37  ;;  %vm946_vm12 = vcmp.eq.s32.totalorder %v944_v32, 1 }
 0x5c7   : > { %v1025_v15 = vadd.f32 %v1023_v42, %v1017_v28  ;;  %v1026_v35 = vadd.f32 %v1024_v46, %v1018_v0  ;;  %v1031_v45 = vmul.f32 %v2311_v39, %v2728_v50  ;;  %v1032_v27 = vmul.f32 %v2311_v39, %v2732_v19 }
 0x5c8   : > { %v922_v49 = vpop.permute.xlu1 %921  ;;  %v832_v11 = vrot.slane %v2688_v9, %v2389_v37  ;;  %v1169_v51 = vmul.f32 %v2330_v52, %v2724_v33  ;;  %v968_v0 = vrot.slane %v960_v2, %v2389_v37  ;;  %v2757_v39 = vsel %vm874_vm7, %v854_v34, 0.0 }
 0x5c9   : > { %v926_v28 = vsel %vm925_vm8, %v922_v49, %v924_v41  ;;  %v927_v46 = vsel %vm925_vm8, %v924_v41, %v922_v49  ;;  %v1033_v6 = vadd.f32 %v1031_v45, %v1025_v15  ;;  %v1034_v12 = vadd.f32 %v1032_v27, %v1026_v35 }
 0x5ca   : > { %v1177_v30 = vadd.f32 %v1175_v61, %v1169_v51  ;;  %v2760_v42 = vsel %vm945_vm10, %v926_v28, 0.0  ;;  %v2763_v58 = vsel %vm946_vm12, %v927_v46, 0.0  ;;  %vm825_vm13 = vcmp.lt.s32.totalorder %v2402_v36, 4 }
 0x5cb   : > { %v1039_v56 = vmul.f32 %v2416_v43, %v2760_v42  ;;  %v1040_v49 = vmul.f32 %v2416_v43, %v2763_v58  ;;  %v840_v20 = vrot.slane %v832_v11, %v2389_v37  ;;  %vm953_vm1 = vcmp.lt.s32.totalorder %v2402_v36, 125 }
 0x5cc   : > { %v950_v40 = vpop.permute.xlu1 %949  ;;  %v1185_v2 = vadd.f32 %v1183_v57, %v1177_v30  ;;  %v1176_v24 = vmul.f32 %v2277_v17, %v2676_v44  ;;  %v964_v61 = vrot.slane %v2712_v53, %v2396_v16  ;;  %v1170_v15 = vmul.f32 %v2330_v52, %v2757_v39 }
 0x5cd   : > { %v1041_v32 = vadd.f32 %v1039_v56, %v1033_v6  ;;  %v1042_v34 = vadd.f32 %v1040_v49, %v1034_v12  ;;  %v1191_v43 = vmul.f32 %v2292_v26, %v2576_v21  ;;  %vm973_vm5 = vcmp.eq.s32.totalorder %v968_v0, 1 }
 0x5ce   : > { %v509_v45 = vadd.s32 4, %v2337_v1  ;;  %v1184_v27 = vmul.f32 %v2339_v54, %v2696_v10  ;;  %v1199_v6 = vmul.f32 %v2359_v14, %v2728_v50  ;;  %v1178_v11 = vadd.f32 %v1176_v24, %v1170_v15 }
 0x5cf   : > { %v2784_v17 = vadd.f32 %v2615_v63, %v1041_v32  ;;  %v2787_v56 = vadd.f32 %v2615_v63, %v1042_v34  ;;  %v1193_v52 = vadd.f32 %v1191_v43, %v1185_v2  ;;  %v972_v51 = vrot.slane %v964_v61, %v2389_v37  ;;  %v3324_v32 = vld [vmem:[#allocation3_spill] sm:$0xff]  ;;  %v3325_v61 = vld [vmem:[#allocation6_spill] sm:$0xff] }
 0x5d0   : > { %v952_v35 = vpop.permute.xlu1 %951  ;;  %vm845_vm14 = vcmp.eq.s32.totalorder %v840_v20, 1  ;;  %v827_v54 = vsel %vm825_vm13, %v2650_v47, %v2642_v62  ;;  %v1207_v63 = vmul.f32 %v2375_v22, %v2760_v42  ;;  %v1186_v57 = vadd.f32 %v1184_v27, %v1178_v11  ;;  %v3326_v27 = vld [vmem:[#allocation13_spill] sm:$0xff] }
 0x5d1   : > { %v954_v12 = vsel %vm953_vm1, %v950_v40, %v952_v35  ;;  %1051 = vrot.lane.b32.xlu1 %v2787_v56, %s2111_s15  ;;  %1049 = vrot.lane.b32.xlu0 %v2784_v17, %s2111_s15  ;;  %vm510_vm0 = vcmp.lt.s32.totalorder %v509_v45, 16  ;;  %v1201_v41 = vadd.f32 %v1199_v6, %v1193_v52  ;;  %v847_v46 = vsel %vm845_vm14, %v827_v54, 0.0  ;;  %v3327_v6 = vld [vmem:[#allocation12_spill] sm:$0xff] }
 0x5d2   : > { %v2794_v1 = vsel %vm973_vm5, %v954_v12, 0.0  ;;  %v1192_v0 = vmul.f32 %v2292_v26, %v2581_v59  ;;  %vm974_vm4 = vcmp.eq.s32.totalorder %v972_v51, 1  ;;  %v955_v30 = vsel %vm953_vm1, %v952_v35, %v950_v40 }
 0x5d3   : > { %v1215_v28 = vmul.f32 %v2391_v38, %v2794_v1  ;;  %v836_v49 = vrot.slane %v2688_v9, %v2396_v16  ;;  %v1383_v20 = vmul.f32 %v2267_v13, %v2724_v33  ;;  %v1209_v2 = vadd.f32 %v1207_v63, %v1201_v41  ;;  %v3328_v41 = vld [vmem:[#allocation7_spill] sm:$0xff] }
 0x5d4   : > { %v2819_v24 = vsel %vm510_vm0, 1, %v3309_v55  ;;  %v1194_v26 = vadd.f32 %v1192_v0, %v1186_v57  ;;  %v1200_v40 = vmul.f32 %v2359_v14, %v2732_v19  ;;  %v1377_v34 = vmul.f32 %v3324_v32, %v847_v46  ;;  %v978_v57 = vpop.permute.xlu1 %977  ;;  %v980_v0 = vpop.permute.xlu0 %979 }
 0x5d5   : > { %1084 = vrot.lane.b32.xlu1 %v2787_v56, %s2077_s26  ;;  %1082 = vrot.lane.b32.xlu0 %v2784_v17, %s2077_s26  ;;  %v1391_v15 = vmul.f32 %v3325_v61, %v2674_v3  ;;  %v2828_v43 = vsel %vm974_vm4, %v955_v30, 0.0  ;;  %v1217_v35 = vadd.f32 %v1215_v28, %v1209_v2  ;;  %v1208_v33 = vmul.f32 %v2375_v22, %v2763_v58  ;;  %v3329_v30 = vld [vmem:[#allocation8_spill] sm:$0xff] }
 0x5d6   : > { %v988_v55 = vrot.slane %v2819_v24, %v2389_v37  ;;  %v844_v45 = vrot.slane %v836_v49, %v2389_v37  ;;  %v1385_v14 = vadd.f32 %v1383_v20, %v1377_v34  ;;  %v1399_v12 = vmul.f32 %v3326_v27, %v2692_v8 }
 0x5d7   : > { %v1202_v3 = vadd.f32 %v1200_v40, %v1194_v26  ;;  %v1216_v52 = vmul.f32 %v2391_v38, %v2828_v43  ;;  %v2844_v11 = vadd.f32 %v3327_v6, %v1217_v35  ;;  %v826_v8 = vsel %vm825_vm13, %v2642_v62, %v2650_v47 }
 0x5d8   : > { %v1393_v22 = vadd.f32 %v1391_v15, %v1385_v14  ;;  %v996_v54 = vrot.slane %v988_v55, %v2389_v37  ;;  %vm846_vm6 = vcmp.eq.s32.totalorder %v844_v45, 1  ;;  %vm981_vm2 = vcmp.lt.s32.totalorder %v2402_v36, 124 }
 0x5d9   : > { %1106 = vrot.lane.b32.xlu1 %v2784_v17, %s2037_s22  ;;  %1108 = vrot.lane.b32.xlu0 %v2787_v56, %s2037_s22  ;;  %v1210_v51 = vadd.f32 %v1208_v33, %v1202_v3  ;;  %v1407_v28 = vmul.f32 %v3328_v41, %v2576_v21  ;;  %v848_v46 = vsel %vm846_vm6, %v826_v8, 0.0  ;;  %v1384_v62 = vmul.f32 %v2267_v13, %v2757_v39  ;;  %v3330_v13 = vld [vmem:[#allocation14_spill] sm:$0xff] }
 0x5da   : > { %v1401_v63 = vadd.f32 %v1399_v12, %v1393_v22  ;;  %vm1001_vm7 = vcmp.eq.s32.totalorder %v996_v54, 1  ;;  %v1415_v49 = vmul.f32 %v3329_v30, %v2728_v50  ;;  %v982_v20 = vsel %vm981_vm2, %v978_v57, %v980_v0  ;;  %v3333_v22 = vld [vmem:[#allocation11_spill] sm:$0xff] }
 0x5db   : > { %v1218_v38 = vadd.f32 %v1216_v52, %v1210_v51  ;;  %v1378_v26 = vmul.f32 %v3324_v32, %v848_v46  ;;  %v1392_v40 = vmul.f32 %v3325_v61, %v2676_v44  ;;  %v1423_v39 = vmul.f32 %v3330_v13, %v2760_v42  ;;  %v3331_v32 = vld [vmem:[#allocation9_spill] sm:$0xff]  ;;  %v3332_v61 = vld [vmem:[#allocation10_spill] sm:$0xff] }
 0x5dc   : > { %v1409_v47 = vadd.f32 %v1407_v28, %v1401_v63  ;;  %v992_v50 = vrot.slane %v2819_v24, %v2396_v16  ;;  %v1003_v34 = vsel %vm1001_vm7, %v982_v20, 0.0  ;;  %v1400_v35 = vmul.f32 %v3326_v27, %v2696_v10 }
 0x5dd   : > { %1122 = vrot.lane.b32.xlu1 %v2784_v17, %s2112_s16  ;;  %1225 = vrot.lane.b32.xlu0 %v2844_v11, %s2113_s18  ;;  %v2869_v2 = vadd.f32 %v3327_v6, %v1218_v38  ;;  %v1386_v15 = vadd.f32 %v1384_v62, %v1378_v26  ;;  %v1431_v55 = vmul.f32 %v3331_v32, %v2794_v1  ;;  %vm1053_vm10 = vcmp.lt.s32.totalorder %v2402_v36, 32 }
 0x5de   : > { %v1417_v33 = vadd.f32 %v1415_v49, %v1409_v47  ;;  %v1439_v45 = vmul.f32 %v3332_v61, %v1003_v34  ;;  %v1000_v12 = vrot.slane %v992_v50, %v2389_v37  ;;  %v1408_v10 = vmul.f32 %v3328_v41, %v2581_v59 }
 0x5df   : > { %v1394_v44 = vadd.f32 %v1392_v40, %v1386_v15  ;;  %v1416_v3 = vmul.f32 %v3329_v30, %v2732_v19  ;;  %v983_v52 = vsel %vm981_vm2, %v980_v0, %v978_v57  ;;  %v1424_v37 = vmul.f32 %v3330_v13, %v2763_v58  ;;  %v2944_v57 = vpop.permute.xlu0 %1358 }
 0x5e0   : > { %v1425_v42 = vadd.f32 %v1423_v39, %v1417_v33  ;;  %vm1002_vm8 = vcmp.eq.s32.totalorder %v1000_v12, 1  ;;  %v1432_v19 = vmul.f32 %v3331_v32, %v2828_v43  ;;  %v1059_v0 = vrot.slane %v2646_v25, %v2377_v23  ;;  %v3353_v33 = vld [vmem:[#allocation24_spill] sm:$0xff] }
 0x5e1   : > { %1124 = vrot.lane.b32.xlu1 %v2787_v56, %s2112_s16  ;;  %1258 = vrot.lane.b32.xlu0 %v2844_v11, %s2111_s15  ;;  %v1402_v16 = vadd.f32 %v1400_v35, %v1394_v44  ;;  %v1004_v51 = vsel %vm1002_vm8, %v983_v52, 0.0  ;;  %v1063_v62 = vrot.slane %v2646_v25, %v2382_v31  ;;  %vm3336_vm1 = vcmp.eq.s32.totalorder %v2529_v7, 1 }
 0x5e2   : > { %v1433_v14 = vadd.f32 %v1431_v55, %v1425_v42  ;;  %v1440_v63 = vmul.f32 %v3332_v61, %v1004_v51  ;;  %v2959_v30 = vrot.slane %v1059_v0, %v2377_v23  ;;  %v1132_v42 = vrot.slane %v2669_v18, %v2377_v23  ;;  %vm3344_vm8 = vmmov %vm3336_vm1 }
 0x5e3   : > { %v1410_v27 = vadd.f32 %v1408_v10, %v1402_v16  ;;  %v2948_v28 = vpop.permute.xlu0 %1607  ;;  %v2962_v49 = vrot.slane %v1063_v62, %v2377_v23  ;;  %v1136_v61 = vrot.slane %v2669_v18, %v2382_v31  ;;  %vm3337_vm5 = vcmp.eq.s32.totalorder %v2540_v29, 1 }
 0x5e4   : > { %v1441_v1 = vadd.f32 %v1439_v45, %v1433_v14  ;;  %vm1072_vm12 = vcmp.eq.s32.totalorder %v2959_v30, 1  ;;  %vm1126_vm14 = vcmp.lt.s32.totalorder %v2402_v36, 96  ;;  %vm1229_vm6 = vcmp.lt.s32.totalorder %v2402_v36, 48 }
 0x5e5   : > { %1227 = vrot.lane.b32.xlu1 %v2869_v2, %s2113_s18  ;;  %1274 = vrot.lane.b32.xlu0 %v2844_v11, %s2077_s26  ;;  %v1418_v54 = vadd.f32 %v1416_v3, %v1410_v27  ;;  %v2946_v41 = vpop.permute.xlu1 %1579  ;;  %vm1073_vm13 = vcmp.eq.s32.totalorder %v2962_v49, 1  ;;  %v1103_v27 = vmul.f32 %v2631_v48, %v2787_v56  ;;  %v1589_v49 = vrot.slane %v2819_v24, %v2377_v23 }
 0x5e6   : > { %v2905_v6 = vadd.f32 %v3333_v22, %v1441_v1  ;;  %v1102_v1 = vmul.f32 %v2631_v48, %v2784_v17  ;;  %v3004_v17 = vrot.slane %v1132_v42, %v2377_v23  ;;  %v3007_v48 = vrot.slane %v1136_v61, %v2377_v23 }
 0x5e7   : > { %v1426_v8 = vadd.f32 %v1424_v37, %v1418_v54  ;;  %v2956_v47 = vpop.permute.xlu0 %1366  ;;  %v3338_v54 = vld [vmem:[#allocation29_spill] sm:$0xff] }
 0x5e8   : > { %vm1145_vm0 = vcmp.eq.s32.totalorder %v3004_v17, 1  ;;  %vm1146_vm4 = vcmp.eq.s32.totalorder %v3007_v48, 1 }
 0x5e9   : > { %1260 = vrot.lane.b32.xlu1 %v2869_v2, %s2111_s15  ;;  %1300 = vrot.lane.b32.xlu0 %v2869_v2, %s2037_s22  ;;  %v1434_v58 = vadd.f32 %v1432_v19, %v1426_v8 }
 0x5ea   : > { %v2950_v46 = vpop.permute.xlu1 %1158 }
 0x5eb   : > { %v1442_v38 = vadd.f32 %v1440_v63, %v1434_v58 }
 0x5ed   : > { %1276 = vrot.lane.b32.xlu1 %v2869_v2, %s2077_s26  ;;  %1314 = vrot.lane.b32.xlu0 %v2844_v11, %s2112_s16  ;;  %v2922_v43 = vadd.f32 %v3333_v22, %v1442_v38 }
 0x5ef   : > { %v1535_v55 = vmul.f32 %v3353_v33, %v2922_v43 }
 0x5f1   : > { %1298 = vrot.lane.b32.xlu1 %v2844_v11, %s2037_s22  ;;  %1482 = vrot.lane.b32.xlu0 %v2905_v6, %s2113_s18 }
 0x5f5   : > { %1316 = vrot.lane.b32.xlu1 %v2869_v2, %s2112_s16  ;;  %1498 = vrot.lane.b32.xlu0 %v2905_v6, %s2111_s15 }
 0x5f9   : > { %1330 = vrot.lane.b32.xlu1 %v2844_v11, %s2114_s19  ;;  %1514 = vrot.lane.b32.xlu0 %v2905_v6, %s2077_s26 }
 0x5fd   : > { %1332 = vrot.lane.b32.xlu1 %v2869_v2, %s2114_s19  ;;  %1540 = vrot.lane.b32.xlu0 %v2922_v43, %s2037_s22 }
 0x601   : > { %1449 = vrot.lane.b32.xlu1 %v2905_v6, %s2115_s20  ;;  %1554 = vrot.lane.b32.xlu0 %v2905_v6, %s2112_s16 }
 0x605   : > { %1451 = vrot.lane.b32.xlu1 %v2922_v43, %s2115_s20  ;;  %1570 = vrot.lane.b32.xlu0 %v2905_v6, %s2114_s19 }
 0x609   : > { %1484 = vrot.lane.b32.xlu1 %v2922_v43, %s2113_s18  ;;  %1615 = vperm.xlu0 %2009, %v2601_v4  }
 0x60d   : > { %1500 = vrot.lane.b32.xlu1 %v2922_v43, %s2111_s15 }
 0x611   : > { %1516 = vrot.lane.b32.xlu1 %v2922_v43, %s2077_s26 }
 0x615   : > { %1538 = vrot.lane.b32.xlu1 %v2905_v6, %s2037_s22 }
 0x619   : > { %1556 = vrot.lane.b32.xlu1 %v2922_v43, %s2112_s16 }
 0x61d   : > { %1572 = vrot.lane.b32.xlu1 %v2922_v43, %s2114_s19 }
 0x643   : > { %v1052_v20 = vpop.permute.xlu1 %1051  ;;  %v1050_v26 = vpop.permute.xlu0 %1049 }
 0x644   : > { %v1054_v40 = vsel %vm1053_vm10, %v1050_v26, %v1052_v20  ;;  %v1055_v25 = vsel %vm1053_vm10, %v1052_v20, %v1050_v26 }
 0x645   : > { %v1074_v39 = vsel %vm1072_vm12, %v1055_v25, 0.0  ;;  %v1075_v50 = vsel %vm1073_vm13, %v1054_v40, 0.0 }
 0x646   : > { %v1080_v45 = vmul.f32 %v2623_v60, %v1074_v39  ;;  %v1081_v16 = vmul.f32 %v2623_v60, %v1075_v50  ;;  %v3339_v39 = vld [vmem:[#allocation31_spill] sm:$0xff] }
 0x647   : > { %v1085_v13 = vpop.permute.xlu1 %1084  ;;  %v1083_v34 = vpop.permute.xlu0 %1082 }
 0x648   : > { %v1086_v15 = vsel %vm556_vm11, %v1083_v34, %v1085_v13  ;;  %v1087_v35 = vsel %vm556_vm11, %v1085_v13, %v1083_v34 }
 0x649   : > { %v1088_v32 = vsel %vm575_vm15, %v1087_v35, 0.0  ;;  %v1089_v44 = vsel %vm576_vm3, %v1086_v15, 0.0  ;;  %v3340_v15 = vld [vmem:[#allocation32_spill] sm:$0xff] }
 0x64a   : > { %v1094_v14 = vmul.f32 %v2611_v5, %v1088_v32  ;;  %v1095_v12 = vmul.f32 %v2611_v5, %v1089_v44  ;;  %v1235_v35 = vrot.slane %v3340_v15, %v2377_v23  ;;  %v1239_v32 = vrot.slane %v3340_v15, %v2382_v31 }
 0x64b   : > { %v1107_v10 = vpop.permute.xlu1 %1106  ;;  %v1109_v3 = vpop.permute.xlu0 %1108 }
 0x64c   : > { %v1096_v52 = vadd.f32 %v1094_v14, %v1080_v45  ;;  %v1097_v37 = vadd.f32 %v1095_v12, %v1081_v16  ;;  %v1110_v18 = vsel %vm747_vm9, %v1107_v10, %v1109_v3  ;;  %v1111_v60 = vsel %vm747_vm9, %v1109_v3, %v1107_v10 }
 0x64d   : > { %v1112_v22 = vsel %vm3336_vm1, %v1110_v18, 0.0  ;;  %v1113_v5 = vsel %vm3337_vm5, %v1111_v60, 0.0  ;;  %v3035_v14 = vrot.slane %v1235_v35, %v2377_v23  ;;  %v3038_v12 = vrot.slane %v1239_v32, %v2377_v23  ;;  %vm3345_vm1 = vmmov %vm3337_vm5 }
 0x64e   : > { %v1104_v56 = vadd.f32 %v1102_v1, %v1096_v52  ;;  %v1105_v51 = vadd.f32 %v1103_v27, %v1097_v37  ;;  %v1118_v19 = vmul.f32 %v3338_v54, %v1112_v22  ;;  %v1119_v8 = vmul.f32 %v3338_v54, %v1113_v5 }
 0x64f   : > { %v1123_v63 = vpop.permute.xlu1 %1122  ;;  %v1226_v58 = vpop.permute.xlu0 %1225  ;;  %vm1248_vm2 = vcmp.eq.s32.totalorder %v3035_v14, 1  ;;  %vm1249_vm7 = vcmp.eq.s32.totalorder %v3038_v12, 1  ;;  %vm3287_vm5 = vcmp.lt.s32.totalorder %v2402_v36, 80 }
 0x650   : > { %v1120_v38 = vadd.f32 %v1118_v19, %v1104_v56  ;;  %v1121_v0 = vadd.f32 %v1119_v8, %v1105_v51 }
 0x653   : > { %v1125_v62 = vpop.permute.xlu1 %1124  ;;  %v1259_v13 = vpop.permute.xlu0 %1258 }
 0x654   : > { %v1127_v20 = vsel %vm1126_vm14, %v1123_v63, %v1125_v62  ;;  %v1128_v26 = vsel %vm1126_vm14, %v1125_v62, %v1123_v63  ;;  %v3341_v63 = vld [vmem:[#allocation19_spill] sm:$0xff] }
 0x655   : > { %v1147_v40 = vsel %vm1145_vm0, %v1127_v20, 0.0  ;;  %v1148_v25 = vsel %vm1146_vm4, %v1128_v26, 0.0  ;;  %v3342_v62 = vld [vmem:[#allocation23_spill] sm:$0xff] }
 0x656   : > { %v1153_v50 = vmul.f32 %v3339_v39, %v1147_v40  ;;  %v1154_v34 = vmul.f32 %v3339_v39, %v1148_v25  ;;  %v3343_v40 = vld [vmem:[#allocation21_spill] sm:$0xff]  ;;  %v1340_v39 = vrot.slane %v2712_v53, %v2377_v23 }
 0x657   : > { %v1228_v44 = vpop.permute.xlu1 %1227  ;;  %v1275_v10 = vpop.permute.xlu0 %1274 }
 0x658   : > { %v1155_v42 = vadd.f32 %v1153_v50, %v1120_v38  ;;  %v1156_v61 = vadd.f32 %v1154_v34, %v1121_v0  ;;  %v1231_v52 = vsel %vm1229_vm6, %v1228_v44, %v1226_v58  ;;  %v1344_v50 = vrot.slane %v2712_v53, %v2382_v31 }
 0x659   : > { %v1250_v56 = vsel %vm1248_vm2, %v1231_v52, 0.0 }
 0x65a   : > { %v3029_v45 = vadd.f32 %v2950_v46, %v1155_v42  ;;  %v3032_v16 = vadd.f32 %v2950_v46, %v1156_v61  ;;  %v1230_v46 = vsel %vm1229_vm6, %v1226_v58, %v1228_v44  ;;  %v1256_v20 = vmul.f32 %v3342_v62, %v1250_v56 }
 0x65b   : > { %v1261_v1 = vpop.permute.xlu1 %1260  ;;  %v1251_v51 = vsel %vm1249_vm7, %v1230_v46, 0.0  ;;  %v1301_v54 = vpop.permute.xlu0 %1300  ;;  %v3346_v46 = vld [vmem:[#allocation22_spill] sm:$0xff] }
 0x65c   : > { %v1262_v27 = vsel %vm1053_vm10, %v1259_v13, %v1261_v1  ;;  %v1263_v3 = vsel %vm1053_vm10, %v1261_v1, %v1259_v13  ;;  %v1257_v26 = vmul.f32 %v3342_v62, %v1251_v51  ;;  %v1294_v52 = vmul.f32 %v3346_v46, %v2844_v11 }
 0x65d   : > { %v1264_v37 = vsel %vm1072_vm12, %v1263_v3, 0.0  ;;  %v1265_v18 = vsel %vm1073_vm13, %v1262_v27, 0.0 }
 0x65e   : > { %v1270_v58 = vmul.f32 %v3341_v63, %v1264_v37  ;;  %v1271_v38 = vmul.f32 %v3341_v63, %v1265_v18  ;;  %v1295_v37 = vmul.f32 %v3346_v46, %v2869_v2  ;;  %v3094_v18 = vrot.slane %v1340_v39, %v2377_v23  ;;  %v3348_v2 = vld [vmem:[#allocation28_spill] sm:$0xff] }
 0x65f   : > { %v1277_v60 = vpop.permute.xlu1 %1276  ;;  %v1315_v44 = vpop.permute.xlu0 %1314 }
 0x660   : > { %v1278_v22 = vsel %vm556_vm11, %v1275_v10, %v1277_v60  ;;  %v1279_v5 = vsel %vm556_vm11, %v1277_v60, %v1275_v10  ;;  %v1272_v34 = vadd.f32 %v1270_v58, %v1256_v20  ;;  %v1273_v15 = vadd.f32 %v1271_v38, %v1257_v26 }
 0x661   : > { %v1280_v19 = vsel %vm575_vm15, %v1279_v5, 0.0  ;;  %v1281_v8 = vsel %vm576_vm3, %v1278_v22, 0.0  ;;  %v3097_v60 = vrot.slane %v1344_v50, %v2377_v23 }
 0x662   : > { %v1286_v25 = vmul.f32 %v3343_v40, %v1280_v19  ;;  %v1287_v13 = vmul.f32 %v3343_v40, %v1281_v8  ;;  %v3347_v19 = vld [vmem:[#allocation25_spill] sm:$0xff] }
 0x663   : > { %v1299_v0 = vpop.permute.xlu1 %1298  ;;  %v1483_v40 = vpop.permute.xlu0 %1482 }
 0x664   : > { %v1302_v35 = vsel %vm747_vm9, %v1299_v0, %v1301_v54  ;;  %v1303_v32 = vsel %vm747_vm9, %v1301_v54, %v1299_v0  ;;  %v1288_v61 = vadd.f32 %v1286_v25, %v1272_v34  ;;  %v1289_v10 = vadd.f32 %v1287_v13, %v1273_v15 }
 0x665   : > { %v1304_v53 = vsel %vm3344_vm8, %v1302_v35, 0.0  ;;  %v1305_v3 = vsel %vm3345_vm1, %v1303_v32, 0.0  ;;  %vm3286_vm8 = vcmp.eq.s32.totalorder %v3094_v18, 1  ;;  %vm3285_vm1 = vcmp.eq.s32.totalorder %v3097_v60, 1 }
 0x666   : > { %v1296_v51 = vadd.f32 %v1294_v52, %v1288_v61  ;;  %v1297_v54 = vadd.f32 %v1295_v37, %v1289_v10  ;;  %v1310_v11 = vmul.f32 %v3347_v19, %v1304_v53  ;;  %v1311_v8 = vmul.f32 %v3347_v19, %v1305_v3 }
 0x667   : > { %v1317_v42 = vpop.permute.xlu1 %1316  ;;  %v1459_v32 = vrot.slane %v2688_v9, %v2377_v23  ;;  %v1163_v10 = vadd.f32 %v3029_v45, %v2576_v21 }
 0x668   : > { %v1318_v1 = vsel %vm1126_vm14, %v1315_v44, %v1317_v42  ;;  %v1319_v27 = vsel %vm1126_vm14, %v1317_v42, %v1315_v44  ;;  %v1312_v0 = vadd.f32 %v1310_v11, %v1296_v51  ;;  %v1313_v62 = vadd.f32 %v1311_v8, %v1297_v54  ;;  %v3349_v11 = vld [vmem:[#allocation18_spill] sm:$0xff] }
 0x669   : > { %v1320_v22 = vsel %vm1145_vm0, %v1318_v1, 0.0  ;;  %v1321_v5 = vsel %vm1146_vm4, %v1319_v27, 0.0  ;;  %v1463_v44 = vrot.slane %v2688_v9, %v2382_v31  ;;  %v1164_v1 = vadd.f32 %v3032_v16, %v2581_v59 }
 0x66a   : > { %v1326_v63 = vmul.f32 %v3348_v2, %v1320_v22  ;;  %v1327_v58 = vmul.f32 %v3348_v2, %v1321_v5  ;;  %v1467_v3 = vrot.slane %v1459_v32, %v2377_v23 }
 0x66b   : > { %v1331_v56 = vpop.permute.xlu1 %1330  ;;  %v1471_v46 = vrot.slane %v1463_v44, %v2377_v23 }
 0x66c   : > { %v1328_v39 = vadd.f32 %v1326_v63, %v1312_v0  ;;  %v1329_v50 = vadd.f32 %v1327_v58, %v1313_v62 }
 0x66f   : > { %v1333_v38 = vpop.permute.xlu1 %1332 }
 0x670   : > { %v1335_v20 = vsel %vm3287_vm5, %v1331_v56, %v1333_v38  ;;  %v1336_v26 = vsel %vm3287_vm5, %v1333_v38, %v1331_v56  ;;  %vm1473_vm5 = vcmp.eq.s32.totalorder %v1471_v46, 1  ;;  %v3350_v38 = vld [vmem:[#allocation17_spill] sm:$0xff]  ;;  %v1534_v46 = vmul.f32 %v3353_v33, %v2905_v6 }
 0x671   : > { %v1355_v25 = vsel %vm3286_vm8, %v1335_v20, 0.0  ;;  %v1356_v13 = vsel %vm3285_vm1, %v1336_v26, 0.0  ;;  %vm1453_vm1 = vcmp.lt.s32.totalorder %v2402_v36, 64  ;;  %vm1472_vm8 = vcmp.eq.s32.totalorder %v1467_v3, 1  ;;  %v3351_v20 = vld [vmem:[#allocation20_spill] sm:$0xff] }
 0x672   : > { %v1361_v34 = vmul.f32 %v2944_v57, %v1355_v25  ;;  %v1362_v15 = vmul.f32 %v2944_v57, %v1356_v13  ;;  %v1499_v57 = vpop.permute.xlu0 %1498 }
 0x673   : > { %v1450_v35 = vpop.permute.xlu1 %1449 }
 0x674   : > { %v1363_v42 = vadd.f32 %v1361_v34, %v1328_v39  ;;  %v1364_v61 = vadd.f32 %v1362_v15, %v1329_v50  ;;  %v1593_v15 = vrot.slane %v2819_v24, %v2382_v31 }
 0x676   : > { %v1369_v27 = vadd.f32 %v2956_v47, %v1363_v42  ;;  %v1370_v53 = vadd.f32 %v2956_v47, %v1364_v61  ;;  %v1515_v22 = vpop.permute.xlu0 %1514  ;;  %v3352_v61 = vld [vmem:[#allocation26_spill] sm:$0xff] }
 0x677   : > { %v1452_v52 = vpop.permute.xlu1 %1451 }
 0x678   : > { %v3132_v37 = vadd.f32 %v1369_v27, %v1163_v10  ;;  %v3134_v9 = vadd.f32 %v1370_v53, %v1164_v1  ;;  %v3137_v59 = vsel %vm1453_vm1, %v1450_v35, %v1452_v52  ;;  %v3139_v45 = vsel %vm1453_vm1, %v1452_v52, %v1450_v35 }
 0x679   : > { %v1474_v51 = vsel %vm1472_vm8, %v3139_v45, 0.0  ;;  %v1475_v54 = vsel %vm1473_vm5, %v3137_v59, 0.0 }
 0x67a   : > { %v1480_v0 = vmul.f32 %v3350_v38, %v1474_v51  ;;  %v1481_v62 = vmul.f32 %v3350_v38, %v1475_v54  ;;  %v1541_v25 = vpop.permute.xlu0 %1540  ;;  %v3356_v51 = vld [vmem:[#allocation27_spill] sm:$0xff] }
 0x67b   : > { %v1485_v21 = vpop.permute.xlu1 %1484 }
 0x67c   : > { %v1486_v47 = vsel %vm1229_vm6, %v1483_v40, %v1485_v21  ;;  %v1487_v16 = vsel %vm1229_vm6, %v1485_v21, %v1483_v40 }
 0x67d   : > { %v1488_v5 = vsel %vm1248_vm2, %v1487_v16, 0.0  ;;  %v1489_v56 = vsel %vm1249_vm7, %v1486_v47, 0.0  ;;  %v1597_v47 = vrot.slane %v1589_v49, %v2377_v23  ;;  %v1601_v16 = vrot.slane %v1593_v15, %v2377_v23  ;;  %v3357_v23 = vld [vmem:[#allocation30_spill] sm:$0xff] }
 0x67e   : > { %v1494_v8 = vmul.f32 %v3349_v11, %v1488_v5  ;;  %v1495_v2 = vmul.f32 %v3349_v11, %v1489_v56  ;;  %v1555_v24 = vpop.permute.xlu0 %1554  ;;  %v3363_v15 = vld [vmem:[#allocation2_spill] sm:$0xff] }
 0x67f   : > { %v1501_v19 = vpop.permute.xlu1 %1500 }
 0x680   : > { %v1502_v63 = vsel %vm1053_vm10, %v1499_v57, %v1501_v19  ;;  %v1503_v58 = vsel %vm1053_vm10, %v1501_v19, %v1499_v57  ;;  %v1496_v39 = vadd.f32 %v1494_v8, %v1480_v0  ;;  %v1497_v50 = vadd.f32 %v1495_v2, %v1481_v62 }
 0x681   : > { %v1504_v14 = vsel %vm1072_vm12, %v1503_v58, 0.0  ;;  %v1505_v12 = vsel %vm1073_vm13, %v1502_v63, 0.0  ;;  %vm3358_vm10 = vcmp.lt.s32.totalorder %v2402_v36, 80  ;;  %vm3360_vm13 = vcmp.eq.s32.totalorder %v3094_v18, 1 }
 0x682   : > { %v1510_v26 = vmul.f32 %v3351_v20, %v1504_v14  ;;  %v1511_v40 = vmul.f32 %v3351_v20, %v1505_v12  ;;  %v1571_v2 = vpop.permute.xlu0 %1570  ;;  %vm3359_vm12 = vmmov %vm3358_vm10 }
 0x683   : > { %v1517_v13 = vpop.permute.xlu1 %1516 }
 0x684   : > { %v1518_v34 = vsel %vm556_vm11, %v1515_v22, %v1517_v13  ;;  %v1519_v30 = vsel %vm556_vm11, %v1517_v13, %v1515_v22  ;;  %v1512_v44 = vadd.f32 %v1510_v26, %v1496_v39  ;;  %v1513_v42 = vadd.f32 %v1511_v40, %v1497_v50 }
 0x685   : > { %v1520_v35 = vsel %vm575_vm15, %v1519_v30, 0.0  ;;  %v1521_v32 = vsel %vm576_vm3, %v1518_v34, 0.0  ;;  %vm3354_vm11 = vcmp.eq.s32.totalorder %v2529_v7, 1  ;;  %vm3355_vm15 = vcmp.eq.s32.totalorder %v2540_v29, 1 }
 0x686   : > { %v1526_v10 = vmul.f32 %v3352_v61, %v1520_v35  ;;  %v1527_v1 = vmul.f32 %v3352_v61, %v1521_v32  ;;  %vm1602_vm3 = vcmp.eq.s32.totalorder %v1597_v47, 1  ;;  %v3365_v61 = vld [vmem:[#allocation4_spill] sm:$0xff] }
 0x687   : > { %v1539_v27 = vpop.permute.xlu1 %1538  ;;  %v1604_v38 = vsel %vm1602_vm3, %v3137_v59, 0.0 }
 0x688   : > { %v1528_v53 = vadd.f32 %v1526_v10, %v1512_v44  ;;  %v1529_v57 = vadd.f32 %v1527_v1, %v1513_v42  ;;  %v1542_v3 = vsel %vm747_vm9, %v1539_v27, %v1541_v25  ;;  %v1543_v31 = vsel %vm747_vm9, %v1541_v25, %v1539_v27  ;;  %v1616_v50 = vpop.permute.xlu0 %1615  ;;  %v3364_v44 = vld [vmem:[#allocation5_spill] sm:$0xff] }
 0x689   : > { %v1544_v52 = vsel %vm3354_vm11, %v1542_v3, 0.0  ;;  %v1545_v21 = vsel %vm3355_vm15, %v1543_v31, 0.0  ;;  %vm1603_vm9 = vcmp.eq.s32.totalorder %v1601_v16, 1  ;;  %v1610_v13 = vmul.f32 %v2948_v28, %v1604_v38 }
 0x68a   : > { %v1536_v22 = vadd.f32 %v1534_v46, %v1528_v53  ;;  %v1537_v5 = vadd.f32 %v1535_v55, %v1529_v57  ;;  %v1550_v54 = vmul.f32 %v3356_v51, %v1544_v52  ;;  %v1551_v43 = vmul.f32 %v3356_v51, %v1545_v21 }
 0x68b   : > { %v1557_v56 = vpop.permute.xlu1 %1556  ;;  %v1605_v48 = vsel %vm1603_vm9, %v3139_v45, 0.0 }
 0x68c   : > { %v1558_v6 = vsel %vm1126_vm14, %v1555_v24, %v1557_v56  ;;  %v1559_v7 = vsel %vm1126_vm14, %v1557_v56, %v1555_v24  ;;  %v1552_v58 = vadd.f32 %v1550_v54, %v1536_v22  ;;  %v1553_v14 = vadd.f32 %v1551_v43, %v1537_v5 }
 0x68d   : > { %v1560_v29 = vsel %vm1145_vm0, %v1558_v6, 0.0  ;;  %v1561_v19 = vsel %vm1146_vm4, %v1559_v7, 0.0  ;;  %vm3361_vm14 = vcmp.eq.s32.totalorder %v3097_v60, 1  ;;  %v1611_v36 = vmul.f32 %v2948_v28, %v1605_v48 }
 0x68e   : > { %v1566_v11 = vmul.f32 %v3357_v23, %v1560_v29  ;;  %v1567_v8 = vmul.f32 %v3357_v23, %v1561_v19  ;;  %vm3362_vm0 = vcmask 64512  }
 0x68f   : > { %v1573_v63 = vpop.permute.xlu1 %1572  ;;  %vm3366_vm4 = vmmov %vm3362_vm0 }
 0x690   : > { %v1574_v12 = vsel %vm3358_vm10, %v1571_v2, %v1573_v63  ;;  %v1575_v17 = vsel %vm3359_vm12, %v1573_v63, %v1571_v2  ;;  %v1568_v20 = vadd.f32 %v1566_v11, %v1552_v58  ;;  %v1569_v26 = vadd.f32 %v1567_v8, %v1553_v14 }
 0x691   : > { %v1576_v0 = vsel %vm3360_vm13, %v1574_v12, 0.0  ;;  %v1577_v62 = vsel %vm3361_vm14, %v1575_v17, 0.0 }
 0x692   : > { %v1582_v40 = vmul.f32 %v2946_v41, %v1576_v0  ;;  %v1583_v25 = vmul.f32 %v2946_v41, %v1577_v62 }
 0x694   : > { %v1584_v39 = vadd.f32 %v1582_v40, %v1568_v20  ;;  %v1585_v59 = vadd.f32 %v1583_v25, %v1569_v26 }
 0x696   : > { %v1612_v45 = vadd.f32 %v1610_v13, %v1584_v39  ;;  %v1613_v34 = vadd.f32 %v1611_v36, %v1585_v59 }
 0x698   : > { %v1618_v18 = vadd.f32 %v1616_v50, %v1612_v45  ;;  %v1619_v30 = vadd.f32 %v1616_v50, %v1613_v34 }
 0x69a   : > { %v1620_v60 = vadd.f32 %v1618_v18, %v3132_v37  ;;  %v1621_v49 = vadd.f32 %v1619_v30, %v3134_v9  ;;  %v2023_v37 = vld [vmem:[%s3242_s1] sm:$0xff] }
 0x69c   : > { %1622 = vmatprep.subr.mxu1 %v1621_v49 }
 0x69d   : > { %1623 = vmatpush1.msra.mxu1 %v1620_v60 }
 0x69e   : > { %1838 = vmatmul.mubr.msk.f32.vlgmr.msra.gmra.mrb[2].mxu1 %vm3362_vm0, %v2601_v4 }
 0x771   : > { %v1688_v41 = vpop.f32.mrb[2].mxu1 }
 0x772   : > { %v1689_v28 = vadd.f32 %v1688_v41, %v3363_v15  ;;  %v1690_v35 = vpop.f32.mrb[3].mxu1 }
 0x773   : > { %v1691_v32 = vadd.f32 %v1690_v35, %v3363_v15 }
 0x774   : > { %v1693_v10 = vmul.f32 %v1689_v28, %v3365_v61 }
 0x775   : > { %v1694_v42 = vmul.f32 %v1691_v32, %v3364_v44 }
 0x777   : > { %1695 = vmatprep.subr.mxu0 %v1694_v42 }
 0x778   : > { %1696 = vmatpush1.msra.mxu0 %v1693_v10 }
 0x779   : > { %1839 = vmatmul.mubr.msk.f32.vlgmr.msra.gmra.mrb[4].mxu0 %vm3366_vm4, %v2023_v37 }
 0x84c   : > { %v1761_v4 = vpop.f32.mrb[4].mxu0 }
 0x84d   : > { %v1762_v9 = vadd.f32 %v1761_v4, %v3363_v15  ;;  %v1763_v1 = vpop.f32.mrb[5].mxu0 }
 0x84e   : > { %v1764_v27 = vadd.f32 %v1763_v1, %v3363_v15 }
 0x84f   : > { %1766 = vst [vmem:[%s172_s25] sm:$0xff] %v1762_v9 }
 0x850   : > { %1767 = vst [vmem:[%s172_s25 + $0x8] sm:$0xff] %v1764_v27 }
 0x851 PF: > { %s13_s12 = sadd.s32 1, %s2030_s12  }
 0x852   : > { %p10_p4 = scmp.ge.s32.totalorder %s13_s12, 4  }
 0x854   :  { %12 = sbr.rel (!%p10_p4) target bundleno = 1 (0x1), region = 62 }

</bundles_post_ra>
